<compile_context>
chip_gen: v6e
topology: v6e:2x2x1
jax: 0.10.0
libtpu: 0.0.40
codegen_flags: <defaults>
</compile_context>

<pallas_src>
import jax
import jax.numpy as jnp
from jax.experimental import pallas as pl
from jax.experimental.pallas import tpu as pltpu

LN_EPS = 1e-5  # torch.nn.LayerNorm default


def _round_up(n, m):
    return ((n + m - 1) // m) * m


def _layernorm(h, gamma, beta):
    mu = jnp.mean(h, axis=-1, keepdims=True)
    var = jnp.mean((h - mu) * (h - mu), axis=-1, keepdims=True)
    return (h - mu) * jax.lax.rsqrt(var + LN_EPS) * gamma + beta


def deepsurv_kernel(
    x_ref,                                   # (TB, D)  f32
    w1_ref, b1_ref, g1_ref, be1_ref,         # (D,64) bf16, (1,64) f32 x3
    w2_ref, b2_ref, g2_ref, be2_ref,         # (64,32) bf16, (1,32) f32 x3
    w3_ref, b3_ref,                          # (8,32) f32 row-replicated, (1,1) f32
    out_ref,                                 # (1, 1, TB) f32  lane-dense slab row
):
    # Block 1: Linear -> LayerNorm -> ReLU (Dropout = identity in eval mode).
    # bf16 cast happens here so the HBM read of x stays a single f32 pass.
    x = x_ref[...].astype(jnp.bfloat16)
    h = jnp.dot(x, w1_ref[...], preferred_element_type=jnp.float32) + b1_ref[...]
    h = _layernorm(h, g1_ref[...], be1_ref[...])
    h = jnp.maximum(h, 0.0)

    # Block 2 (bf16 MXU inputs, f32 accumulate / elementwise).
    h = jnp.dot(h.astype(jnp.bfloat16), w2_ref[...],
                preferred_element_type=jnp.float32) + b2_ref[...]
    h = _layernorm(h, g2_ref[...], be2_ref[...])
    h = jnp.maximum(h, 0.0)

    # Risk head Linear(32,1), emitted lane-dense:
    # (8,32) @ (TB,32)^T -> (8,TB); keep row 0.  This matmul doubles as the
    # sublane->lane relayout so the output store / writeback DMA are dense.
    res = jax.lax.dot_general(
        w3_ref[...], h,
        dimension_numbers=(((1,), (1,)), ((), ())),
        preferred_element_type=jnp.float32)
    o_row = res[0:1, :] + b3_ref[...]                      # (1, TB)
    out_ref[...] = o_row.reshape(out_ref.shape).astype(out_ref.dtype)


def prepare_params(params):
    """One-time kernel-ready parameter prep (hoisted out of the forward call)."""
    w1, b1, g1, be1, w2, b2, g2, be2, w3, b3 = params
    w3_slab = jnp.tile(w3.reshape(1, -1), (8, 1)).astype(jnp.float32)  # (8,32)
    return [w1.astype(jnp.bfloat16), b1, g1, be1,
            w2.astype(jnp.bfloat16), b2, g2, be2,
            w3_slab, b3]


def deepsurv_forward(x, prepped, *, batch_tile=8192):
    """x: [B, D] float32.  prepped: output of prepare_params()."""
    B, D = x.shape
    tb = max(8, min(_round_up(batch_tile, 8), _round_up(B, 8)))
    n_tiles = pl.cdiv(B, tb)

    def const_spec(a):
        idx = (0,) * a.ndim
        return pl.BlockSpec(a.shape, lambda i, _idx=idx: _idx)

    in_specs = [pl.BlockSpec((tb, D), lambda i: (i, 0))]
    in_specs += [const_spec(a) for a in prepped]

    # x double-buffer + f32 intermediates + headroom; floor 32 MiB (covers
    # v5e's 16 MiB default scoped limit), cap 60 MiB (< v7x physical 64 MiB).
    vmem_limit = int(min(max(2 * tb * D * 4 + 8 * tb * 64 * 4 + (6 << 20),
                             32 << 20), 60 << 20))

    slab = pl.pallas_call(
        deepsurv_kernel,
        out_shape=jax.ShapeDtypeStruct((n_tiles, 1, tb), jnp.float32),
        grid=(n_tiles,),
        in_specs=in_specs,
        out_specs=pl.BlockSpec((1, 1, tb), lambda i: (i, 0, 0)),
        compiler_params=pltpu.CompilerParams(
            dimension_semantics=("parallel",),
            vmem_limit_bytes=vmem_limit,
        ),
    )(x, *prepped)

    # Ragged-tail garbage rows (network is row-independent) are dropped here.
    return slab.reshape(n_tiles * tb)[:B].reshape(B, 1)


def init_params(key, input_dim, hidden_dims):
    """Deterministic xavier_uniform weights, zero biases, LN gamma=1 beta=0."""
    dims = [input_dim] + list(hidden_dims) + [1]
    params = []
    n_layers = len(dims) - 1
    keys = jax.random.split(key, n_layers)
    for li in range(n_layers):
        fan_in, fan_out = dims[li], dims[li + 1]
        bound = (6.0 / (fan_in + fan_out)) ** 0.5
        # stored as [in, out] so kernel does x @ W (== torch x @ W.T)
        w = jax.random.uniform(
            keys[li], (fan_in, fan_out), jnp.float32, -bound, bound)
        b = jnp.zeros((1, fan_out), jnp.float32)
        params.append(w)
        params.append(b)
        if li < n_layers - 1:  # hidden layer -> LayerNorm affine params
            params.append(jnp.ones((1, fan_out), jnp.float32))   # gamma
            params.append(jnp.zeros((1, fan_out), jnp.float32))  # beta
    return params


def reference_forward_f32(x, params):
    """Pure-f32 JAX reference (exact module semantics, eval mode)."""
    w1, b1, g1, be1, w2, b2, g2, be2, w3, b3 = params
    h = x @ w1 + b1
    h = _layernorm(h, g1, be1)
    h = jnp.maximum(h, 0.0)
    h = h @ w2 + b2
    h = _layernorm(h, g2, be2)
    h = jnp.maximum(h, 0.0)
    return h @ w3 + b3


def reference_forward_mixed(x, params):
    """Reference matching the kernel's numerics (bf16 MXU inputs, f32 rest)."""
    w1, b1, g1, be1, w2, b2, g2, be2, w3, b3 = params
    h = jnp.dot(x.astype(jnp.bfloat16), w1.astype(jnp.bfloat16),
                preferred_element_type=jnp.float32) + b1
    h = _layernorm(h, g1, be1)
    h = jnp.maximum(h, 0.0)
    h = jnp.dot(h.astype(jnp.bfloat16), w2.astype(jnp.bfloat16),
                preferred_element_type=jnp.float32) + b2
    h = _layernorm(h, g2, be2)
    h = jnp.maximum(h, 0.0)
    return jnp.sum(h * w3.reshape(1, -1), axis=-1, keepdims=True) + b3


if __name__ == "__main__":
    key = jax.random.PRNGKey(0)
    k_x1, k_x2, k_p = jax.random.split(key, 3)

    D = 32                       # input_dim <= 100 -> hidden_dims = [64, 32]
    hidden_dims = [64, 32]
    params = init_params(k_p, D, hidden_dims)
    prepped = prepare_params(params)

    # Test 1: single ragged tile (B=300 -> tb=304; 4 padded throwaway rows).
    B1 = 300
    x1 = jax.random.normal(k_x1, (B1, D), dtype=jnp.float32)
    out1 = jax.block_until_ready(deepsurv_forward(x1, prepped))
    assert out1.shape == (B1, 1), out1.shape
    ref1_mixed = reference_forward_mixed(x1, params)
    ref1_f32 = reference_forward_f32(x1, params)
    assert jnp.allclose(out1, ref1_mixed, atol=2e-3, rtol=2e-3), (
        float(jnp.max(jnp.abs(out1 - ref1_mixed))))
    assert jnp.allclose(out1, ref1_f32, atol=1e-1, rtol=5e-2), (
        float(jnp.max(jnp.abs(out1 - ref1_f32))))

    # Test 2: multi-step pipelined grid with ragged last tile
    # (B=1000, batch_tile=256 -> 4 grid steps, 24 throwaway rows in step 3).
    B2 = 1000
    x2 = jax.random.normal(k_x2, (B2, D), dtype=jnp.float32)
    out2 = jax.block_until_ready(deepsurv_forward(x2, prepped, batch_tile=256))
    assert out2.shape == (B2, 1), out2.shape
    ref2_mixed = reference_forward_mixed(x2, params)
    ref2_f32 = reference_forward_f32(x2, params)
    assert jnp.allclose(out2, ref2_mixed, atol=2e-3, rtol=2e-3), (
        float(jnp.max(jnp.abs(out2 - ref2_mixed))))
    assert jnp.allclose(out2, ref2_f32, atol=1e-1, rtol=5e-2), (
        float(jnp.max(jnp.abs(out2 - ref2_f32))))

    print("KERNEL_OK")
</pallas_src>

<mosaic_0001>
module attributes {stable_mosaic.version = 11 : i64} {
  func.func @deepsurv_kernel(%arg0: i32, %arg1: memref<304x32xf32, #tpu.memory_space<vmem>>, %arg2: memref<32x64xbf16, #tpu.memory_space<vmem>>, %arg3: memref<1x64xf32, #tpu.memory_space<vmem>>, %arg4: memref<1x64xf32, #tpu.memory_space<vmem>>, %arg5: memref<1x64xf32, #tpu.memory_space<vmem>>, %arg6: memref<64x32xbf16, #tpu.memory_space<vmem>>, %arg7: memref<1x32xf32, #tpu.memory_space<vmem>>, %arg8: memref<1x32xf32, #tpu.memory_space<vmem>>, %arg9: memref<1x32xf32, #tpu.memory_space<vmem>>, %arg10: memref<8x32xf32, #tpu.memory_space<vmem>>, %arg11: memref<1x1xf32, #tpu.memory_space<vmem>>, %arg12: memref<1x1x304xf32, #tpu.memory_space<vmem>>) attributes {dimension_semantics = [#tpu.dimension_semantics<parallel>], iteration_bounds = array<i64: 1>, scalar_prefetch = 0 : i64, scratch_operands = 0 : i64, tpu.core_type = #tpu.core_type<tc>, window_params = [{transform_indices = @transform_0, window_bounds = array<i64: 304, 32>}, {pipeline_mode = #tpu.pipeline_mode<synchronous>, transform_indices = @transform_1, window_bounds = array<i64: 32, 64>}, {pipeline_mode = #tpu.pipeline_mode<synchronous>, transform_indices = @transform_2, window_bounds = array<i64: 1, 64>}, {pipeline_mode = #tpu.pipeline_mode<synchronous>, transform_indices = @transform_3, window_bounds = array<i64: 1, 64>}, {pipeline_mode = #tpu.pipeline_mode<synchronous>, transform_indices = @transform_4, window_bounds = array<i64: 1, 64>}, {pipeline_mode = #tpu.pipeline_mode<synchronous>, transform_indices = @transform_5, window_bounds = array<i64: 64, 32>}, {pipeline_mode = #tpu.pipeline_mode<synchronous>, transform_indices = @transform_6, window_bounds = array<i64: 1, 32>}, {pipeline_mode = #tpu.pipeline_mode<synchronous>, transform_indices = @transform_7, window_bounds = array<i64: 1, 32>}, {pipeline_mode = #tpu.pipeline_mode<synchronous>, transform_indices = @transform_8, window_bounds = array<i64: 1, 32>}, {pipeline_mode = #tpu.pipeline_mode<synchronous>, transform_indices = @transform_9, window_bounds = array<i64: 8, 32>}, {pipeline_mode = #tpu.pipeline_mode<synchronous>, transform_indices = @transform_10, window_bounds = array<i64: 1, 1>}, {transform_indices = @transform_11, window_bounds = array<i64: 1, 1, 304>}]} {
    %c0 = arith.constant 0 : index
    %c0_0 = arith.constant 0 : index
    %0 = vector.load %arg1[%c0, %c0_0] : memref<304x32xf32, #tpu.memory_space<vmem>>, vector<304x32xf32>
    %1 = arith.truncf %0 : vector<304x32xf32> to vector<304x32xbf16>
    %c0_1 = arith.constant 0 : index
    %c0_2 = arith.constant 0 : index
    %2 = vector.load %arg2[%c0_1, %c0_2] : memref<32x64xbf16, #tpu.memory_space<vmem>>, vector<32x64xbf16>
    %cst = arith.constant dense<0.000000e+00> : vector<304x64xf32>
    %3 = tpu.matmul %1, %2, %cst {dimension_numbers = #tpu.dot_dimension_numbers<[1], [0], [0], [1], [0, 0, 1, 1], [], []>} : vector<304x32xbf16>, vector<32x64xbf16>, vector<304x64xf32> -> vector<304x64xf32>
    %c0_3 = arith.constant 0 : index
    %c0_4 = arith.constant 0 : index
    %4 = vector.load %arg3[%c0_3, %c0_4] : memref<1x64xf32, #tpu.memory_space<vmem>>, vector<1x64xf32>
    %5 = vector.broadcast %4 : vector<1x64xf32> to vector<304x64xf32>
    %6 = arith.addf %3, %5 : vector<304x64xf32>
    %c0_5 = arith.constant 0 : index
    %c0_6 = arith.constant 0 : index
    %7 = vector.load %arg4[%c0_5, %c0_6] : memref<1x64xf32, #tpu.memory_space<vmem>>, vector<1x64xf32>
    %c0_7 = arith.constant 0 : index
    %c0_8 = arith.constant 0 : index
    %8 = vector.load %arg5[%c0_7, %c0_8] : memref<1x64xf32, #tpu.memory_space<vmem>>, vector<1x64xf32>
    %cst_9 = arith.constant dense<0.000000e+00> : vector<304xf32>
    %9 = vector.multi_reduction <add>, %6, %cst_9 [1] : vector<304x64xf32> to vector<304xf32>
    %10 = vector.shape_cast %9 : vector<304xf32> to vector<304x1xf32>
    %cst_10 = arith.constant 6.400000e+01 : f32
    %11 = vector.broadcast %cst_10 : f32 to vector<304x1xf32>
    %12 = arith.divf %10, %11 : vector<304x1xf32>
    %13 = vector.broadcast %12 : vector<304x1xf32> to vector<304x64xf32>
    %14 = arith.subf %6, %13 : vector<304x64xf32>
    %15 = vector.broadcast %12 : vector<304x1xf32> to vector<304x64xf32>
    %16 = arith.subf %6, %15 : vector<304x64xf32>
    %17 = arith.mulf %14, %16 : vector<304x64xf32>
    %cst_11 = arith.constant dense<0.000000e+00> : vector<304xf32>
    %18 = vector.multi_reduction <add>, %17, %cst_11 [1] : vector<304x64xf32> to vector<304xf32>
    %19 = vector.shape_cast %18 : vector<304xf32> to vector<304x1xf32>
    %cst_12 = arith.constant 6.400000e+01 : f32
    %20 = vector.broadcast %cst_12 : f32 to vector<304x1xf32>
    %21 = arith.divf %19, %20 : vector<304x1xf32>
    %22 = vector.broadcast %12 : vector<304x1xf32> to vector<304x64xf32>
    %23 = arith.subf %6, %22 : vector<304x64xf32>
    %cst_13 = arith.constant 9.99999974E-6 : f32
    %24 = vector.broadcast %cst_13 : f32 to vector<304x1xf32>
    %25 = arith.addf %21, %24 : vector<304x1xf32>
    %26 = math.rsqrt %25 : vector<304x1xf32>
    %27 = vector.broadcast %26 : vector<304x1xf32> to vector<304x64xf32>
    %28 = arith.mulf %23, %27 : vector<304x64xf32>
    %29 = vector.broadcast %7 : vector<1x64xf32> to vector<304x64xf32>
    %30 = arith.mulf %28, %29 : vector<304x64xf32>
    %31 = vector.broadcast %8 : vector<1x64xf32> to vector<304x64xf32>
    %32 = arith.addf %30, %31 : vector<304x64xf32>
    %cst_14 = arith.constant 0.000000e+00 : f32
    %33 = vector.broadcast %cst_14 : f32 to vector<304x64xf32>
    %34 = arith.maximumf %32, %33 : vector<304x64xf32>
    %35 = arith.truncf %34 : vector<304x64xf32> to vector<304x64xbf16>
    %c0_15 = arith.constant 0 : index
    %c0_16 = arith.constant 0 : index
    %36 = vector.load %arg6[%c0_15, %c0_16] : memref<64x32xbf16, #tpu.memory_space<vmem>>, vector<64x32xbf16>
    %cst_17 = arith.constant dense<0.000000e+00> : vector<304x32xf32>
    %37 = tpu.matmul %35, %36, %cst_17 {dimension_numbers = #tpu.dot_dimension_numbers<[1], [0], [0], [1], [0, 0, 1, 1], [], []>} : vector<304x64xbf16>, vector<64x32xbf16>, vector<304x32xf32> -> vector<304x32xf32>
    %c0_18 = arith.constant 0 : index
    %c0_19 = arith.constant 0 : index
    %38 = vector.load %arg7[%c0_18, %c0_19] : memref<1x32xf32, #tpu.memory_space<vmem>>, vector<1x32xf32>
    %39 = vector.broadcast %38 : vector<1x32xf32> to vector<304x32xf32>
    %40 = arith.addf %37, %39 : vector<304x32xf32>
    %c0_20 = arith.constant 0 : index
    %c0_21 = arith.constant 0 : index
    %41 = vector.load %arg8[%c0_20, %c0_21] : memref<1x32xf32, #tpu.memory_space<vmem>>, vector<1x32xf32>
    %c0_22 = arith.constant 0 : index
    %c0_23 = arith.constant 0 : index
    %42 = vector.load %arg9[%c0_22, %c0_23] : memref<1x32xf32, #tpu.memory_space<vmem>>, vector<1x32xf32>
    %cst_24 = arith.constant dense<0.000000e+00> : vector<304xf32>
    %43 = vector.multi_reduction <add>, %40, %cst_24 [1] : vector<304x32xf32> to vector<304xf32>
    %44 = vector.shape_cast %43 : vector<304xf32> to vector<304x1xf32>
    %cst_25 = arith.constant 3.200000e+01 : f32
    %45 = vector.broadcast %cst_25 : f32 to vector<304x1xf32>
    %46 = arith.divf %44, %45 : vector<304x1xf32>
    %47 = vector.broadcast %46 : vector<304x1xf32> to vector<304x32xf32>
    %48 = arith.subf %40, %47 : vector<304x32xf32>
    %49 = vector.broadcast %46 : vector<304x1xf32> to vector<304x32xf32>
    %50 = arith.subf %40, %49 : vector<304x32xf32>
    %51 = arith.mulf %48, %50 : vector<304x32xf32>
    %cst_26 = arith.constant dense<0.000000e+00> : vector<304xf32>
    %52 = vector.multi_reduction <add>, %51, %cst_26 [1] : vector<304x32xf32> to vector<304xf32>
    %53 = vector.shape_cast %52 : vector<304xf32> to vector<304x1xf32>
    %cst_27 = arith.constant 3.200000e+01 : f32
    %54 = vector.broadcast %cst_27 : f32 to vector<304x1xf32>
    %55 = arith.divf %53, %54 : vector<304x1xf32>
    %56 = vector.broadcast %46 : vector<304x1xf32> to vector<304x32xf32>
    %57 = arith.subf %40, %56 : vector<304x32xf32>
    %cst_28 = arith.constant 9.99999974E-6 : f32
    %58 = vector.broadcast %cst_28 : f32 to vector<304x1xf32>
    %59 = arith.addf %55, %58 : vector<304x1xf32>
    %60 = math.rsqrt %59 : vector<304x1xf32>
    %61 = vector.broadcast %60 : vector<304x1xf32> to vector<304x32xf32>
    %62 = arith.mulf %57, %61 : vector<304x32xf32>
    %63 = vector.broadcast %41 : vector<1x32xf32> to vector<304x32xf32>
    %64 = arith.mulf %62, %63 : vector<304x32xf32>
    %65 = vector.broadcast %42 : vector<1x32xf32> to vector<304x32xf32>
    %66 = arith.addf %64, %65 : vector<304x32xf32>
    %cst_29 = arith.constant 0.000000e+00 : f32
    %67 = vector.broadcast %cst_29 : f32 to vector<304x32xf32>
    %68 = arith.maximumf %66, %67 : vector<304x32xf32>
    %c0_30 = arith.constant 0 : index
    %c0_31 = arith.constant 0 : index
    %69 = vector.load %arg10[%c0_30, %c0_31] : memref<8x32xf32, #tpu.memory_space<vmem>>, vector<8x32xf32>
    %cst_32 = arith.constant dense<0.000000e+00> : vector<8x304xf32>
    %70 = tpu.matmul %69, %68, %cst_32 {dimension_numbers = #tpu.dot_dimension_numbers<[1], [1], [0], [0], [0, 0, 1, 0], [], []>} : vector<8x32xf32>, vector<304x32xf32>, vector<8x304xf32> -> vector<8x304xf32>
    %71 = vector.extract_strided_slice %70 {offsets = [0, 0], sizes = [1, 304], strides = [1, 1]} : vector<8x304xf32> to vector<1x304xf32>
    %c0_33 = arith.constant 0 : index
    %c0_34 = arith.constant 0 : index
    %72 = vector.load %arg11[%c0_33, %c0_34] : memref<1x1xf32, #tpu.memory_space<vmem>>, vector<1x1xf32>
    %73 = vector.broadcast %72 : vector<1x1xf32> to vector<1x304xf32>
    %74 = arith.addf %71, %73 : vector<1x304xf32>
    %75 = vector.shape_cast %74 : vector<1x304xf32> to vector<1x1x304xf32>
    %c0_35 = arith.constant 0 : index
    %c0_36 = arith.constant 0 : index
    %c0_37 = arith.constant 0 : index
    %76 = vector.load %arg12[%c0_35, %c0_36, %c0_37] : memref<1x1x304xf32, #tpu.memory_space<vmem>>, vector<1x1x304xf32>
    tpu.vector_store %arg12[%c0_35, %c0_36, %c0_37], %75 {strides = array<i32>} : memref<1x1x304xf32, #tpu.memory_space<vmem>>, vector<1x1x304xf32>,
    return
  }
  func.func @transform_0(%arg0: i32) -> (i32, i32) {
    %c0_i32 = arith.constant 0 : i32
    %c0_i32_0 = arith.constant 0 : i32
    return %arg0, %c0_i32 : i32, i32
  }
  func.func @transform_1(%arg0: i32) -> (i32, i32) {
    %c0_i32 = arith.constant 0 : i32
    %c0_i32_0 = arith.constant 0 : i32
    %c0_i32_1 = arith.constant 0 : i32
    return %c0_i32, %c0_i32_0 : i32, i32
  }
  func.func @transform_2(%arg0: i32) -> (i32, i32) {
    %c0_i32 = arith.constant 0 : i32
    %c0_i32_0 = arith.constant 0 : i32
    %c0_i32_1 = arith.constant 0 : i32
    return %c0_i32, %c0_i32_0 : i32, i32
  }
  func.func @transform_3(%arg0: i32) -> (i32, i32) {
    %c0_i32 = arith.constant 0 : i32
    %c0_i32_0 = arith.constant 0 : i32
    %c0_i32_1 = arith.constant 0 : i32
    return %c0_i32, %c0_i32_0 : i32, i32
  }
  func.func @transform_4(%arg0: i32) -> (i32, i32) {
    %c0_i32 = arith.constant 0 : i32
    %c0_i32_0 = arith.constant 0 : i32
    %c0_i32_1 = arith.constant 0 : i32
    return %c0_i32, %c0_i32_0 : i32, i32
  }
  func.func @transform_5(%arg0: i32) -> (i32, i32) {
    %c0_i32 = arith.constant 0 : i32
    %c0_i32_0 = arith.constant 0 : i32
    %c0_i32_1 = arith.constant 0 : i32
    return %c0_i32, %c0_i32_0 : i32, i32
  }
  func.func @transform_6(%arg0: i32) -> (i32, i32) {
    %c0_i32 = arith.constant 0 : i32
    %c0_i32_0 = arith.constant 0 : i32
    %c0_i32_1 = arith.constant 0 : i32
    return %c0_i32, %c0_i32_0 : i32, i32
  }
  func.func @transform_7(%arg0: i32) -> (i32, i32) {
    %c0_i32 = arith.constant 0 : i32
    %c0_i32_0 = arith.constant 0 : i32
    %c0_i32_1 = arith.constant 0 : i32
    return %c0_i32, %c0_i32_0 : i32, i32
  }
  func.func @transform_8(%arg0: i32) -> (i32, i32) {
    %c0_i32 = arith.constant 0 : i32
    %c0_i32_0 = arith.constant 0 : i32
    %c0_i32_1 = arith.constant 0 : i32
    return %c0_i32, %c0_i32_0 : i32, i32
  }
  func.func @transform_9(%arg0: i32) -> (i32, i32) {
    %c0_i32 = arith.constant 0 : i32
    %c0_i32_0 = arith.constant 0 : i32
    %c0_i32_1 = arith.constant 0 : i32
    return %c0_i32, %c0_i32_0 : i32, i32
  }
  func.func @transform_10(%arg0: i32) -> (i32, i32) {
    %c0_i32 = arith.constant 0 : i32
    %c0_i32_0 = arith.constant 0 : i32
    %c0_i32_1 = arith.constant 0 : i32
    return %c0_i32, %c0_i32_0 : i32, i32
  }
  func.func @transform_11(%arg0: i32) -> (i32, i32, i32) {
    %c0_i32 = arith.constant 0 : i32
    %c0_i32_0 = arith.constant 0 : i32
    %c0_i32_1 = arith.constant 0 : i32
    return %arg0, %c0_i32, %c0_i32_0 : i32, i32, i32
  }
}

</mosaic_0001>

<bundles_post_ra>
// kernel: tpu_custom_call.1
= control target key start
LH: loop header
LB: loop body
LE: loop exit
PB: predicated region body
PF: predicated region fallthrough
CT: control target
= control target key end

     0   :  { %s4326_s0 = inlined_call_operand.vmem [shape: f32[300,32], index: 0, kind: input, shape index: {}]   ;;  %s4327_s1 = inlined_call_operand.vmem [shape: bf16[32,64], index: 1, kind: input, shape index: {}]   ;;  %s4328_s2 = inlined_call_operand.vmem [shape: f32[1,64], index: 2, kind: input, shape index: {}]   ;;  %s4329_s3 = inlined_call_operand.vmem [shape: f32[1,64], index: 3, kind: input, shape index: {}]   ;;  %s4330_s4 = inlined_call_operand.vmem [shape: f32[1,64], index: 4, kind: input, shape index: {}]   ;;  %s4331_s5 = inlined_call_operand.vmem [shape: bf16[64,32], index: 5, kind: input, shape index: {}]   ;;  %s4332_s6 = inlined_call_operand.vmem [shape: f32[1,32], index: 6, kind: input, shape index: {}]   ;;  %s4333_s7 = inlined_call_operand.vmem [shape: f32[1,32], index: 7, kind: input, shape index: {}]   ;;  %s4334_s8 = inlined_call_operand.vmem [shape: f32[1,32], index: 8, kind: input, shape index: {}]   ;;  %s4335_s9 = inlined_call_operand.vmem [shape: f32[8,32], index: 9, kind: input, shape index: {}]   ;;  %s4336_s10 = inlined_call_operand.<no memory space> [shape: f32[1,1], index: 10, kind: input, shape index: {}]   ;;  %s4337_s11 = inlined_call_operand.hbm [shape: f32[1,1,304], index: 11, kind: output, shape index: {}]  }
   0x1   :  { %v16_v0 = vstv %s4336_s10 }
   0x2   :  { %17 = vst [vmem:[#allocation2] sm:$0x1] %v16_v0 }
   0x3   :  { %v2590_v1 = vld [vmem:[%s4327_s1 + $0x8] sm:$0xff]   ;;  %v2772_v2 = vmov 0.0   ;;  %v2591_v3 = vld [vmem:[%s4327_s1] sm:$0xff]   ;;  %vm2773_vm0 = vmmov 0   ;;  %vm122_vm1 = vcmask 261120   ;;  %v44_v7 = vld [vmem:[%s4326_s0 + $0x10] sm:$0xff] }
   0x4   :  { %2405 = vmatprep.subr.bf16.mxu0 %v2772_v2  ;;  %2485 = vmatprep.subr.bf16.mxu1 %v2772_v2  ;;  %v42_v4 = vld [vmem:[%s4326_s0] sm:$0xff]  ;;  %v43_v5 = vld [vmem:[%s4326_s0 + $0x8] sm:$0xff]  ;;  %v45_v8 = vld [vmem:[%s4326_s0 + $0x18] sm:$0xff] }
   0x5   :  { %2406 = vmatpush3.bf16.msra.mxu0 %v2590_v1  ;;  %2409 = vmatprep.mubr.msk.bf16.mxu0 %vm2773_vm0, %v2772_v2  ;;  %v80_v6 = vpack.c.bf16 %v43_v5, %v42_v4  ;;  %v81_v9 = vpack.c.bf16 %v45_v8, %v44_v7 }
   0x6   :  { %2407 = vmatprep.subr.bf16.mxu0 %v2772_v2  ;;  %2493 = vmatprep.mubr.msk.bf16.mxu1 %vm2773_vm0, %v2772_v2 }
   0x9   :  { %2408 = vmatpush3.bf16.msra.mxu0 %v2591_v3 }
   0xc   :  { %2410 = vmatmul.mubr.msk.bf16.vlgmr.msra.gmra.mxu0 %vm122_vm1, %v80_v6 }
   0xd   :  { %2413 = vmatprep.mubr.msk.bf16.mxu0 %vm2773_vm0, %v2772_v2 }
   0xe   :  { %18 = vsyncpa [#allocation4], 0  ;;  %v46_v10 = vld [vmem:[%s4326_s0 + $0x20] sm:$0xff]  ;;  %v47_v11 = vld [vmem:[%s4326_s0 + $0x28] sm:$0xff]  ;;  %vm367_vm2 = vcmask 523264  }
   0xf   :  { %v82_v12 = vpack.c.bf16 %v47_v11, %v46_v10  ;;  %v48_v13 = vld [vmem:[%s4326_s0 + $0x30] sm:$0xff]  ;;  %v49_v14 = vld [vmem:[%s4326_s0 + $0x38] sm:$0xff]  ;;  %v50_v16 = vld [vmem:[%s4326_s0 + $0x40] sm:$0xff] }
  0x10   :  { %v83_v15 = vpack.c.bf16 %v49_v14, %v48_v13  ;;  %v51_v17 = vld [vmem:[%s4326_s0 + $0x48] sm:$0xff]  ;;  %v52_v19 = vld [vmem:[%s4326_s0 + $0x50] sm:$0xff]  ;;  %v53_v20 = vld [vmem:[%s4326_s0 + $0x58] sm:$0xff] }
  0x11   :  { %v84_v18 = vpack.c.bf16 %v51_v17, %v50_v16  ;;  %v85_v21 = vpack.c.bf16 %v53_v20, %v52_v19  ;;  %v54_v22 = vld [vmem:[%s4326_s0 + $0x60] sm:$0xff]  ;;  %v55_v23 = vld [vmem:[%s4326_s0 + $0x68] sm:$0xff]  ;;  %v56_v25 = vld [vmem:[%s4326_s0 + $0x70] sm:$0xff] }
  0x12   :  { %v86_v24 = vpack.c.bf16 %v55_v23, %v54_v22  ;;  %v57_v26 = vld [vmem:[%s4326_s0 + $0x78] sm:$0xff]  ;;  %v58_v28 = vld [vmem:[%s4326_s0 + $0x80] sm:$0xff]  ;;  %v59_v29 = vld [vmem:[%s4326_s0 + $0x88] sm:$0xff] }
  0x13   :  { %v87_v27 = vpack.c.bf16 %v57_v26, %v56_v25  ;;  %v88_v30 = vpack.c.bf16 %v59_v29, %v58_v28  ;;  %v60_v31 = vld [vmem:[%s4326_s0 + $0x90] sm:$0xff]  ;;  %v61_v32 = vld [vmem:[%s4326_s0 + $0x98] sm:$0xff]  ;;  %v62_v34 = vld [vmem:[%s4326_s0 + $0xa0] sm:$0xff] }
  0x14   :  { %2414 = vmatmul.mubr.msk.bf16.gmra.mxu0 %vm122_vm1, %v81_v9  ;;  %v89_v33 = vpack.c.bf16 %v61_v32, %v60_v31  ;;  %v63_v35 = vld [vmem:[%s4326_s0 + $0xa8] sm:$0xff]  ;;  %v64_v37 = vld [vmem:[%s4326_s0 + $0xb0] sm:$0xff]  ;;  %v65_v38 = vld [vmem:[%s4326_s0 + $0xb8] sm:$0xff] }
  0x15   :  { %2417 = vmatprep.mubr.msk.bf16.mxu0 %vm2773_vm0, %v2772_v2  ;;  %v90_v36 = vpack.c.bf16 %v63_v35, %v62_v34  ;;  %v91_v39 = vpack.c.bf16 %v65_v38, %v64_v37  ;;  %v66_v40 = vld [vmem:[%s4326_s0 + $0xc0] sm:$0xff]  ;;  %v67_v41 = vld [vmem:[%s4326_s0 + $0xc8] sm:$0xff]  ;;  %v68_v43 = vld [vmem:[%s4326_s0 + $0xd0] sm:$0xff] }
  0x16   :  { %v92_v42 = vpack.c.bf16 %v67_v41, %v66_v40  ;;  %v69_v44 = vld [vmem:[%s4326_s0 + $0xd8] sm:$0xff]  ;;  %v70_v46 = vld [vmem:[%s4326_s0 + $0xe0] sm:$0xff]  ;;  %v71_v47 = vld [vmem:[%s4326_s0 + $0xe8] sm:$0xff] }
  0x17   :  { %v93_v45 = vpack.c.bf16 %v69_v44, %v68_v43  ;;  %v94_v48 = vpack.c.bf16 %v71_v47, %v70_v46  ;;  %v72_v49 = vld [vmem:[%s4326_s0 + $0xf0] sm:$0xff]  ;;  %v73_v50 = vld [vmem:[%s4326_s0 + $0xf8] sm:$0xff]  ;;  %v74_v52 = vld [vmem:[%s4326_s0 + $0x100] sm:$0xff] }
  0x18   :  { %v95_v51 = vpack.c.bf16 %v73_v50, %v72_v49  ;;  %v75_v53 = vld [vmem:[%s4326_s0 + $0x108] sm:$0xff]  ;;  %v76_v55 = vld [vmem:[%s4326_s0 + $0x110] sm:$0xff]  ;;  %v77_v56 = vld [vmem:[%s4326_s0 + $0x118] sm:$0xff] }
  0x19   :  { %v96_v54 = vpack.c.bf16 %v75_v53, %v74_v52  ;;  %v97_v57 = vpack.c.bf16 %v77_v56, %v76_v55  ;;  %v78_v58 = vld [vmem:[%s4326_s0 + $0x120] sm:$0xff]  ;;  %v79_v59 = vld [vmem:[%s4326_s0 + $0x128] sm:$0xff] }
  0x1a   :  { %v98_v60 = vpack.c.bf16 %v79_v59, %v78_v58  ;;  %v3025_v61 = vld [vmem:[%s4328_s2] ss:$0 sm:$0xff] }
  0x1c   :  { %2418 = vmatmul.mubr.msk.bf16.gmra.mxu0 %vm122_vm1, %v82_v12 }
  0x1d   :  { %2421 = vmatprep.mubr.msk.bf16.mxu0 %vm2773_vm0, %v2772_v2 }
  0x24   :  { %2422 = vmatmul.mubr.msk.bf16.gmra.mxu0 %vm122_vm1, %v83_v15 }
  0x25   :  { %2425 = vmatprep.mubr.msk.bf16.mxu0 %vm2773_vm0, %v2772_v2 }
  0x2c   :  { %2426 = vmatmul.mubr.msk.bf16.gmra.mxu0 %vm122_vm1, %v84_v18 }
  0x2d   :  { %2429 = vmatprep.mubr.msk.bf16.mxu0 %vm2773_vm0, %v2772_v2 }
  0x34   :  { %2430 = vmatmul.mubr.msk.bf16.gmra.mxu0 %vm122_vm1, %v85_v21 }
  0x35   :  { %2433 = vmatprep.mubr.msk.bf16.mxu0 %vm2773_vm0, %v2772_v2 }
  0x3c   :  { %2434 = vmatmul.mubr.msk.bf16.gmra.mxu0 %vm122_vm1, %v86_v24 }
  0x3d   :  { %2437 = vmatprep.mubr.msk.bf16.mxu0 %vm2773_vm0, %v2772_v2 }
  0x44   :  { %2438 = vmatmul.mubr.msk.bf16.gmra.mxu0 %vm122_vm1, %v87_v27 }
  0x45   :  { %2441 = vmatprep.mubr.msk.bf16.mxu0 %vm2773_vm0, %v2772_v2 }
  0x4c   :  { %2442 = vmatmul.mubr.msk.bf16.gmra.mxu0 %vm122_vm1, %v88_v30 }
  0x4d   :  { %2445 = vmatprep.mubr.msk.bf16.mxu0 %vm2773_vm0, %v2772_v2 }
  0x54   :  { %2446 = vmatmul.mubr.msk.bf16.gmra.mxu0 %vm122_vm1, %v89_v33 }
  0x55   :  { %2449 = vmatprep.mubr.msk.bf16.mxu0 %vm2773_vm0, %v2772_v2 }
  0x5c   :  { %2450 = vmatmul.mubr.msk.bf16.gmra.mxu0 %vm122_vm1, %v90_v36 }
  0x5d   :  { %2453 = vmatprep.mubr.msk.bf16.mxu0 %vm2773_vm0, %v2772_v2 }
  0x64   :  { %2454 = vmatmul.mubr.msk.bf16.gmra.mxu0 %vm122_vm1, %v91_v39 }
  0x65   :  { %2457 = vmatprep.mubr.msk.bf16.mxu0 %vm2773_vm0, %v2772_v2 }
  0x6c   :  { %2458 = vmatmul.mubr.msk.bf16.gmra.mxu0 %vm122_vm1, %v92_v42 }
  0x6d   :  { %2461 = vmatprep.mubr.msk.bf16.mxu0 %vm2773_vm0, %v2772_v2 }
  0x74   :  { %2462 = vmatmul.mubr.msk.bf16.gmra.mxu0 %vm122_vm1, %v93_v45 }
  0x75   :  { %2465 = vmatprep.mubr.msk.bf16.mxu0 %vm2773_vm0, %v2772_v2 }
  0x7c   :  { %2466 = vmatmul.mubr.msk.bf16.gmra.mxu0 %vm122_vm1, %v94_v48 }
  0x7d   :  { %2469 = vmatprep.mubr.msk.bf16.mxu0 %vm2773_vm0, %v2772_v2 }
  0x84   :  { %2470 = vmatmul.mubr.msk.bf16.gmra.mxu0 %vm122_vm1, %v95_v51 }
  0x85   :  { %2473 = vmatprep.mubr.msk.bf16.mxu0 %vm2773_vm0, %v2772_v2 }
  0x8c   :  { %2474 = vmatmul.mubr.msk.bf16.gmra.mxu0 %vm122_vm1, %v96_v54 }
  0x8d   :  { %2477 = vmatprep.mubr.msk.bf16.mxu0 %vm2773_vm0, %v2772_v2 }
  0x94   :  { %2478 = vmatmul.mubr.msk.bf16.gmra.mxu0 %vm122_vm1, %v97_v57 }
  0x95   :  { %2481 = vmatprep.mubr.msk.bf16.mxu0 %vm2773_vm0, %v2772_v2 }
  0x9c   :  { %2482 = vmatmul.mubr.msk.bf16.gmra.mxu0 %vm122_vm1, %v98_v60 }
  0xcc   :  { %v214_v62 = vpop.f32.mrf.mxu0 }
  0xcd   :  { %v3028_v63 = vadd.f32 %v3025_v61, %v214_v62 }
  0xce   :  { %v2411_v0 = vpop.f32.mrf.mxu0 }
  0xcf   :  { %v368_v1 = vsel %vm367_vm2, %v3028_v63, 0.0 }
  0xd0   :  { %369 = vadd.xlane.f32.xlu0 %v368_v1  ;;  %v217_v3 = vpop.f32.mrf.mxu0 }
  0xd1   :  { %v3033_v4 = vadd.f32 %v3025_v61, %v217_v3 }
  0xd2   :  { %v2412_v5 = vpop.f32.mrf.mxu0 }
  0xd3   :  { %v371_v6 = vsel %vm367_vm2, %v3033_v4, 0.0 }
  0xd4   :  { %372 = vadd.xlane.f32.xlu0 %v371_v6  ;;  %v222_v7 = vpop.f32.mrf.mxu0 }
  0xd5   :  { %v3038_v8 = vadd.f32 %v3025_v61, %v222_v7 }
  0xd6   :  { %v2415_v9 = vpop.f32.mrf.mxu0 }
  0xd7   :  { %v374_v10 = vsel %vm367_vm2, %v3038_v8, 0.0 }
  0xd8   :  { %375 = vadd.xlane.f32.xlu1 %v374_v10  ;;  %v225_v11 = vpop.f32.mrf.mxu0 }
  0xd9   :  { %v3043_v12 = vadd.f32 %v3025_v61, %v225_v11 }
  0xda   :  { %v2416_v13 = vpop.f32.mrf.mxu0 }
  0xdb   :  { %v377_v14 = vsel %vm367_vm2, %v3043_v12, 0.0 }
  0xdc   :  { %378 = vadd.xlane.f32.xlu1 %v377_v14  ;;  %v230_v15 = vpop.f32.mrf.mxu0 }
  0xdd   :  { %v3048_v16 = vadd.f32 %v3025_v61, %v230_v15 }
  0xde   :  { %v2419_v17 = vpop.f32.mrf.mxu0 }
  0xdf   :  { %v380_v18 = vsel %vm367_vm2, %v3048_v16, 0.0 }
  0xe0   :  { %381 = vadd.xlane.f32.xlu0 %v380_v18  ;;  %v233_v19 = vpop.f32.mrf.mxu0 }
  0xe1   :  { %v3053_v20 = vadd.f32 %v3025_v61, %v233_v19 }
  0xe2   :  { %v2420_v21 = vpop.f32.mrf.mxu0 }
  0xe3   :  { %v383_v22 = vsel %vm367_vm2, %v3053_v20, 0.0 }
  0xe4   :  { %384 = vadd.xlane.f32.xlu1 %v383_v22  ;;  %v238_v23 = vpop.f32.mrf.mxu0 }
  0xe5   :  { %v3058_v24 = vadd.f32 %v3025_v61, %v238_v23 }
  0xe6   :  { %v2423_v25 = vpop.f32.mrf.mxu0 }
  0xe7   :  { %v386_v26 = vsel %vm367_vm2, %v3058_v24, 0.0 }
  0xe8   :  { %387 = vadd.xlane.f32.xlu0 %v386_v26  ;;  %v241_v27 = vpop.f32.mrf.mxu0 }
  0xe9   :  { %v3063_v28 = vadd.f32 %v3025_v61, %v241_v27 }
  0xea   :  { %v2424_v29 = vpop.f32.mrf.mxu0 }
  0xeb   :  { %v389_v30 = vsel %vm367_vm2, %v3063_v28, 0.0 }
  0xec   :  { %390 = vadd.xlane.f32.xlu1 %v389_v30  ;;  %v246_v31 = vpop.f32.mrf.mxu0 }
  0xed   :  { %v3068_v32 = vadd.f32 %v3025_v61, %v246_v31 }
  0xee   :  { %v2427_v33 = vpop.f32.mrf.mxu0 }
  0xef   :  { %v392_v34 = vsel %vm367_vm2, %v3068_v32, 0.0 }
  0xf0   :  { %393 = vadd.xlane.f32.xlu0 %v392_v34  ;;  %v249_v35 = vpop.f32.mrf.mxu0 }
  0xf1   :  { %v3073_v36 = vadd.f32 %v3025_v61, %v249_v35 }
  0xf2   :  { %v2428_v37 = vpop.f32.mrf.mxu0 }
  0xf3   :  { %v395_v38 = vsel %vm367_vm2, %v3073_v36, 0.0 }
  0xf4   :  { %396 = vadd.xlane.f32.xlu1 %v395_v38  ;;  %v254_v39 = vpop.f32.mrf.mxu0 }
  0xf5   :  { %v3078_v40 = vadd.f32 %v3025_v61, %v254_v39 }
  0xf6   :  { %v2431_v41 = vpop.f32.mrf.mxu0 }
  0xf7   :  { %v398_v42 = vsel %vm367_vm2, %v3078_v40, 0.0 }
  0xf8   :  { %399 = vadd.xlane.f32.xlu0 %v398_v42  ;;  %v257_v43 = vpop.f32.mrf.mxu0 }
  0xf9   :  { %v3083_v44 = vadd.f32 %v3025_v61, %v257_v43 }
  0xfa   :  { %v2432_v45 = vpop.f32.mrf.mxu0 }
  0xfb   :  { %v401_v46 = vsel %vm367_vm2, %v3083_v44, 0.0 }
  0xfc   :  { %402 = vadd.xlane.f32.xlu1 %v401_v46  ;;  %v262_v47 = vpop.f32.mrf.mxu0 }
  0xfd   :  { %v3088_v48 = vadd.f32 %v3025_v61, %v262_v47 }
  0xfe   :  { %v2435_v49 = vpop.f32.mrf.mxu0 }
  0xff   :  { %v404_v50 = vsel %vm367_vm2, %v3088_v48, 0.0 }
 0x100   :  { %405 = vadd.xlane.f32.xlu0 %v404_v50  ;;  %v265_v51 = vpop.f32.mrf.mxu0 }
 0x101   :  { %v3093_v52 = vadd.f32 %v3025_v61, %v265_v51 }
 0x102   :  { %v2436_v53 = vpop.f32.mrf.mxu0 }
 0x103   :  { %v407_v54 = vsel %vm367_vm2, %v3093_v52, 0.0 }
 0x104   :  { %408 = vadd.xlane.f32.xlu1 %v407_v54  ;;  %v270_v55 = vpop.f32.mrf.mxu0 }
 0x105   :  { %v3098_v56 = vadd.f32 %v3025_v61, %v270_v55 }
 0x106   :  { %v2439_v57 = vpop.f32.mrf.mxu0 }
 0x107   :  { %v410_v58 = vsel %vm367_vm2, %v3098_v56, 0.0 }
 0x108   :  { %411 = vadd.xlane.f32.xlu0 %v410_v58  ;;  %v273_v59 = vpop.f32.mrf.mxu0 }
 0x109   :  { %v3103_v60 = vadd.f32 %v3025_v61, %v273_v59 }
 0x10a   :  { %v2440_v62 = vpop.f32.mrf.mxu0 }
 0x10b   :  { %v413_v0 = vsel %vm367_vm2, %v3103_v60, 0.0 }
 0x10c   :  { %414 = vadd.xlane.f32.xlu1 %v413_v0  ;;  %v278_v1 = vpop.f32.mrf.mxu0 }
 0x10d   :  { %v3108_v3 = vadd.f32 %v3025_v61, %v278_v1 }
 0x10e   :  { %v2443_v5 = vpop.f32.mrf.mxu0 }
 0x10f   :  { %v416_v6 = vsel %vm367_vm2, %v3108_v3, 0.0 }
 0x110   :  { %417 = vadd.xlane.f32.xlu0 %v416_v6  ;;  %v281_v7 = vpop.f32.mrf.mxu0 }
 0x111   :  { %v3113_v9 = vadd.f32 %v3025_v61, %v281_v7 }
 0x112   :  { %v2444_v10 = vpop.f32.mrf.mxu0 }
 0x113   :  { %v419_v11 = vsel %vm367_vm2, %v3113_v9, 0.0 }
 0x114   :  { %420 = vadd.xlane.f32.xlu1 %v419_v11  ;;  %v286_v13 = vpop.f32.mrf.mxu0 }
 0x115   :  { %v3118_v14 = vadd.f32 %v3025_v61, %v286_v13 }
 0x116   :  { %v2447_v15 = vpop.f32.mrf.mxu0 }
 0x117   :  { %v422_v17 = vsel %vm367_vm2, %v3118_v14, 0.0 }
 0x118   :  { %423 = vadd.xlane.f32.xlu0 %v422_v17  ;;  %v289_v18 = vpop.f32.mrf.mxu0 }
 0x119   :  { %v3123_v19 = vadd.f32 %v3025_v61, %v289_v18 }
 0x11a   :  { %v2448_v21 = vpop.f32.mrf.mxu0 }
 0x11b   :  { %v425_v22 = vsel %vm367_vm2, %v3123_v19, 0.0 }
 0x11c   :  { %426 = vadd.xlane.f32.xlu1 %v425_v22  ;;  %v294_v23 = vpop.f32.mrf.mxu0 }
 0x11d   :  { %v3155_v13 = vadd.f32 %v3025_v61, %v294_v23 }
 0x11e   :  { %v2451_v25 = vpop.f32.mrf.mxu0 }
 0x120   :  { %v297_v26 = vpop.f32.mrf.mxu0 }
 0x121   :  { %v3168_v23 = vadd.f32 %v3025_v61, %v297_v26 }
 0x122   :  { %v2452_v27 = vpop.f32.mrf.mxu0 }
 0x123   :  { %v428_v27 = vsel %vm367_vm2, %v3155_v13, 0.0 }
 0x124   :  { %v302_v29 = vpop.f32.mrf.mxu0 }
 0x126   :  { %v2455_v30 = vpop.f32.mrf.mxu0 }
 0x128   :  { %v305_v31 = vpop.f32.mrf.mxu0 }
 0x12a   :  { %v2456_v33 = vpop.f32.mrf.mxu0 }
 0x12c   :  { %v3127_v34 = vpop.f32.mrf.mxu0 }
 0x12e   :  { %v2459_v35 = vpop.f32.mrf.mxu0 }
 0x130   :  { %v3129_v37 = vpop.f32.mrf.mxu0 }
 0x132   :  { %v2460_v38 = vpop.f32.mrf.mxu0 }
 0x134   :  { %v3131_v39 = vpop.f32.mrf.mxu0 }
 0x136   :  { %v2463_v41 = vpop.f32.mrf.mxu0 }
 0x137   :  { %v3177_v41 = vadd.f32 %v3025_v61, %v302_v29  ;;  %v3190_v29 = vadd.f32 %v3025_v61, %v305_v31 }
 0x138   :  { %v3133_v42 = vpop.f32.mrf.mxu0 }
 0x13a   :  { %v2464_v43 = vpop.f32.mrf.mxu0 }
 0x13c   :  { %v3135_v45 = vpop.f32.mrf.mxu0 }
 0x13e   :  { %v2467_v46 = vpop.f32.mrf.mxu0 }
 0x140   :  { %v3137_v47 = vpop.f32.mrf.mxu0 }
 0x142   :  { %v2468_v49 = vpop.f32.mrf.mxu0 }
 0x144   :  { %v3139_v50 = vpop.f32.mrf.mxu0 }
 0x146   :  { %v2471_v51 = vpop.f32.mrf.mxu0 }
 0x148   :  { %v3141_v53 = vpop.f32.mrf.mxu0 }
 0x14a   :  { %v2472_v54 = vpop.f32.mrf.mxu0 }
 0x14b   :  { %v434_v54 = vsel %vm367_vm2, %v3177_v41, 0.0 }
 0x14c   :  { %v3143_v55 = vpop.f32.mrf.mxu0 }
 0x14e   :  { %v2475_v57 = vpop.f32.mrf.mxu0 }
 0x150   :  { %v3145_v58 = vpop.f32.mrf.mxu0 }
 0x152   :  { %v2476_v59 = vpop.f32.mrf.mxu0 }
 0x154   :  { %v3147_v62 = vpop.f32.mrf.mxu0 }
 0x156   :  { %v2479_v0 = vpop.f32.mrf.mxu0 }
 0x158   :  { %v3149_v1 = vpop.f32.mrf.mxu0 }
 0x159   :  { %v370_v5 = vpop.xlane.xlu0 %369 }
 0x15a   :  { %v483_v6 = vmul.f32 0.015625, %v370_v5  ;;  %v2480_v7 = vpop.f32.mrf.mxu0 }
 0x15b   :  { %v3202_v7 = vadd.f32 %v3025_v61, %v3127_v34  ;;  %v3216_v34 = vadd.f32 %v3025_v61, %v3129_v37  ;;  %v3230_v37 = vadd.f32 %v3025_v61, %v3131_v39  ;;  %v3242_v39 = vadd.f32 %v3025_v61, %v3133_v42 }
 0x15c   :  { %v3152_v10 = vsub.f32 %v3028_v63, %v483_v6  ;;  %v437_v6 = vsel %vm367_vm2, %v3190_v29, 0.0 }
 0x15d   :  { %v373_v11 = vpop.xlane.xlu0 %372  ;;  %v449_v42 = vsel %vm367_vm2, %v3242_v39, 0.0 }
 0x15e   :  { %v484_v15 = vmul.f32 0.015625, %v373_v11  ;;  %v559_v17 = vmul.f32 %v3152_v10, %v3152_v10  ;;  %v3208_v11 = vpop.f32.mrf.mxu0 }
 0x160   :  { %v3160_v18 = vsub.f32 %v3033_v4, %v484_v15  ;;  %v597_v21 = vsel %vm367_vm2, %v559_v17, 0.0 }
 0x161   :  { %v376_v22 = vpop.xlane.xlu1 %375  ;;  %598 = vadd.xlane.f32.xlu0 %v597_v21 }
 0x162   :  { %v485_v25 = vmul.f32 0.015625, %v376_v22  ;;  %v560_v63 = vmul.f32 %v3160_v18, %v3160_v18  ;;  %v440_v22 = vsel %vm367_vm2, %v3202_v7, 0.0 }
 0x164   :  { %v3171_v30 = vsub.f32 %v3038_v8, %v485_v25  ;;  %v600_v4 = vsel %vm367_vm2, %v560_v63, 0.0  ;;  %v431_v8 = vsel %vm367_vm2, %v3168_v23, 0.0 }
 0x165   :  { %v379_v33 = vpop.xlane.xlu1 %378  ;;  %601 = vadd.xlane.f32.xlu1 %v600_v4  ;;  %429 = vadd.xlane.f32.xlu0 %v428_v27 }
 0x166   :  { %v486_v35 = vmul.f32 0.015625, %v379_v33  ;;  %v561_v38 = vmul.f32 %v3171_v30, %v3171_v30 }
 0x168   :  { %v3180_v43 = vsub.f32 %v3043_v12, %v486_v35  ;;  %v603_v26 = vsel %vm367_vm2, %v561_v38, 0.0  ;;  %v443_v38 = vsel %vm367_vm2, %v3216_v34, 0.0 }
 0x169   :  { %v382_v46 = vpop.xlane.xlu0 %381  ;;  %604 = vadd.xlane.f32.xlu0 %v603_v26  ;;  %432 = vadd.xlane.f32.xlu1 %v431_v8 }
 0x16a   :  { %v487_v49 = vmul.f32 0.015625, %v382_v46  ;;  %v562_v51 = vmul.f32 %v3180_v43, %v3180_v43 }
 0x16c   :  { %v3193_v12 = vsub.f32 %v3048_v16, %v487_v49  ;;  %v606_v57 = vsel %vm367_vm2, %v562_v51, 0.0 }
 0x16d   :  { %v385_v59 = vpop.xlane.xlu1 %384  ;;  %607 = vadd.xlane.f32.xlu1 %v606_v57  ;;  %435 = vadd.xlane.f32.xlu0 %v434_v54  ;;  %v446_v54 = vsel %vm367_vm2, %v3230_v37, 0.0 }
 0x16e   :  { %v488_v0 = vmul.f32 0.015625, %v385_v59  ;;  %v563_v5 = vmul.f32 %v3193_v12, %v3193_v12 }
 0x170   :  { %v3205_v31 = vsub.f32 %v3053_v20, %v488_v0  ;;  %v609_v16 = vsel %vm367_vm2, %v563_v5, 0.0  ;;  %v2483_v20 = vpop.f32.mrf.mxu0 }
 0x171   :  { %v388_v15 = vpop.xlane.xlu0 %387  ;;  %610 = vadd.xlane.f32.xlu0 %v609_v16  ;;  %438 = vadd.xlane.f32.xlu1 %v437_v6  ;;  %v3257_v16 = vadd.f32 %v3025_v61, %v3135_v45 }
 0x172   :  { %v489_v17 = vmul.f32 0.015625, %v388_v15  ;;  %v564_v21 = vmul.f32 %v3205_v31, %v3205_v31  ;;  %v3222_v27 = vpop.f32.mrf.mxu0 }
 0x173   :  { %v452_v20 = vsel %vm367_vm2, %v3257_v16, 0.0 }
 0x174   :  { %v3219_v25 = vsub.f32 %v3058_v24, %v489_v17  ;;  %v612_v63 = vsel %vm367_vm2, %v564_v21, 0.0  ;;  %v2484_v24 = vpop.f32.mrf.mxu0 }
 0x175   :  { %v391_v4 = vpop.xlane.xlu1 %390  ;;  %613 = vadd.xlane.f32.xlu1 %v612_v63  ;;  %441 = vadd.xlane.f32.xlu0 %v440_v22  ;;  %v3273_v63 = vadd.f32 %v3025_v61, %v3137_v47 }
 0x176   :  { %v490_v33 = vmul.f32 0.015625, %v391_v4  ;;  %v565_v35 = vmul.f32 %v3219_v25, %v3219_v25 }
 0x177   :  { %v455_v24 = vsel %vm367_vm2, %v3273_v63, 0.0 }
 0x178   :  { %v3233_v26 = vsub.f32 %v3063_v28, %v490_v33  ;;  %v615_v8 = vsel %vm367_vm2, %v565_v35, 0.0  ;;  %v2592_v28 = vld [vmem:[%s4331_s5 + $0x18] sm:$0xff]  }
 0x179   :  { %v394_v46 = vpop.xlane.xlu0 %393  ;;  %616 = vadd.xlane.f32.xlu0 %v615_v8  ;;  %444 = vadd.xlane.f32.xlu1 %v443_v38  ;;  %v3289_v8 = vadd.f32 %v3025_v61, %v3139_v50 }
 0x17a   :  { %v491_v49 = vmul.f32 0.015625, %v394_v46  ;;  %v566_v51 = vmul.f32 %v3233_v26, %v3233_v26  ;;  %2486 = vmatpush3.bf16.msra.mxu1 %v2592_v28 }
 0x17b   :  { %2487 = vmatprep.subr.bf16.mxu1 %v2772_v2  ;;  %v458_v28 = vsel %vm367_vm2, %v3289_v8, 0.0 }
 0x17c   :  { %v3248_v57 = vsub.f32 %v3068_v32, %v491_v49  ;;  %v618_v59 = vsel %vm367_vm2, %v566_v51, 0.0  ;;  %v2593_v32 = vld [vmem:[%s4331_s5 + $0x10] sm:$0xff]  }
 0x17d   :  { %v397_v0 = vpop.xlane.xlu1 %396  ;;  %619 = vadd.xlane.f32.xlu1 %v618_v59  ;;  %447 = vadd.xlane.f32.xlu0 %v446_v54  ;;  %v3305_v59 = vadd.f32 %v3025_v61, %v3141_v53 }
 0x17e   :  { %v492_v5 = vmul.f32 0.015625, %v397_v0  ;;  %v567_v6 = vmul.f32 %v3248_v57, %v3248_v57  ;;  %2488 = vmatpush3.bf16.msra.mxu1 %v2593_v32 }
 0x17f   :  { %2489 = vmatprep.subr.bf16.mxu1 %v2772_v2  ;;  %v461_v32 = vsel %vm367_vm2, %v3305_v59, 0.0 }
 0x180   :  { %v3264_v15 = vsub.f32 %v3073_v36, %v492_v5  ;;  %v621_v17 = vsel %vm367_vm2, %v567_v6, 0.0  ;;  %v2594_v36 = vld [vmem:[%s4331_s5 + $0x8] sm:$0xff]  }
 0x181   :  { %v400_v21 = vpop.xlane.xlu0 %399  ;;  %622 = vadd.xlane.f32.xlu0 %v621_v17  ;;  %450 = vadd.xlane.f32.xlu1 %v449_v42 }
 0x182   :  { %v493_v22 = vmul.f32 0.015625, %v400_v21  ;;  %v568_v45 = vmul.f32 %v3264_v15, %v3264_v15  ;;  %2490 = vmatpush3.bf16.msra.mxu1 %v2594_v36 }
 0x183   :  { %2491 = vmatprep.subr.bf16.mxu1 %v2772_v2 }
 0x184   :  { %v3280_v4 = vsub.f32 %v3078_v40, %v493_v22  ;;  %v624_v33 = vsel %vm367_vm2, %v568_v45, 0.0  ;;  %v2595_v40 = vld [vmem:[%s4331_s5] sm:$0xff]  }
 0x185   :  { %v403_v35 = vpop.xlane.xlu1 %402  ;;  %625 = vadd.xlane.f32.xlu1 %v624_v33  ;;  %453 = vadd.xlane.f32.xlu0 %v452_v20 }
 0x186   :  { %v494_v38 = vmul.f32 0.015625, %v403_v35  ;;  %v569_v47 = vmul.f32 %v3280_v4, %v3280_v4  ;;  %2492 = vmatpush3.bf16.msra.mxu1 %v2595_v40 }
 0x187   :  { %2569 = vmatprep.subr.mxu1 %v2772_v2 }
 0x188   :  { %v3296_v46 = vsub.f32 %v3083_v44, %v494_v38  ;;  %v627_v49 = vsel %vm367_vm2, %v569_v47, 0.0 }
 0x189   :  { %v406_v51 = vpop.xlane.xlu0 %405  ;;  %628 = vadd.xlane.f32.xlu0 %v627_v49  ;;  %456 = vadd.xlane.f32.xlu1 %v455_v24 }
 0x18a   :  { %v495_v54 = vmul.f32 0.015625, %v406_v51  ;;  %v570_v50 = vmul.f32 %v3296_v46, %v3296_v46 }
 0x18c   :  { %v3309_v44 = vsub.f32 %v3088_v48, %v495_v54  ;;  %v630_v0 = vsel %vm367_vm2, %v570_v50, 0.0  ;;  %v3342_v50 = vadd.f32 %v3025_v61, %v3143_v55 }
 0x18d   :  { %v409_v5 = vpop.xlane.xlu1 %408  ;;  %631 = vadd.xlane.f32.xlu1 %v630_v0  ;;  %459 = vadd.xlane.f32.xlu0 %v458_v28 }
 0x18e   :  { %v496_v6 = vmul.f32 0.015625, %v409_v5  ;;  %v571_v42 = vmul.f32 %v3309_v44, %v3309_v44 }
 0x190   :  { %v3317_v53 = vsub.f32 %v3093_v52, %v496_v6  ;;  %v633_v17 = vsel %vm367_vm2, %v571_v42, 0.0  ;;  %v464_v42 = vsel %vm367_vm2, %v3342_v50, 0.0 }
 0x191   :  { %v412_v21 = vpop.xlane.xlu0 %411  ;;  %634 = vadd.xlane.f32.xlu0 %v633_v17  ;;  %462 = vadd.xlane.f32.xlu1 %v461_v32  ;;  %v3354_v32 = vadd.f32 %v3025_v61, %v3145_v58 }
 0x192   :  { %v497_v48 = vmul.f32 0.015625, %v412_v21  ;;  %v572_v22 = vmul.f32 %v3317_v53, %v3317_v53 }
 0x194   :  { %v3323_v45 = vsub.f32 %v3098_v56, %v497_v48  ;;  %v636_v20 = vsel %vm367_vm2, %v572_v22, 0.0  ;;  %v467_v22 = vsel %vm367_vm2, %v3354_v32, 0.0 }
 0x195   :  { %v415_v36 = vpop.xlane.xlu1 %414  ;;  %637 = vadd.xlane.f32.xlu1 %v636_v20  ;;  %v3366_v20 = vadd.f32 %v3025_v61, %v3147_v62 }
 0x196   :  { %v498_v33 = vmul.f32 0.015625, %v415_v36  ;;  %v573_v52 = vmul.f32 %v3323_v45, %v3323_v45 }
 0x198   :  { %v3329_v35 = vsub.f32 %v3103_v60, %v498_v33  ;;  %v639_v38 = vsel %vm367_vm2, %v573_v52, 0.0  ;;  %v470_v33 = vsel %vm367_vm2, %v3366_v20, 0.0  ;;  %v3378_v52 = vadd.f32 %v3025_v61, %v3149_v1 }
 0x199   :  { %v418_v47 = vpop.xlane.xlu0 %417  ;;  %640 = vadd.xlane.f32.xlu0 %v639_v38 }
 0x19a   :  { %v499_v24 = vmul.f32 0.015625, %v418_v47  ;;  %v574_v56 = vmul.f32 %v3329_v35, %v3329_v35 }
 0x19c   :  { %v3335_v40 = vsub.f32 %v3108_v3, %v499_v24  ;;  %v642_v49 = vsel %vm367_vm2, %v574_v56, 0.0 }
 0x19d   :  { %v421_v51 = vpop.xlane.xlu1 %420  ;;  %643 = vadd.xlane.f32.xlu1 %v642_v49 }
 0x19e   :  { %v500_v54 = vmul.f32 0.015625, %v421_v51  ;;  %v575_v60 = vmul.f32 %v3335_v40, %v3335_v40 }
 0x1a0   :  { %v3345_v28 = vsub.f32 %v3113_v9, %v500_v54  ;;  %v645_v0 = vsel %vm367_vm2, %v575_v60, 0.0 }
 0x1a1   :  { %v424_v5 = vpop.xlane.xlu0 %423  ;;  %646 = vadd.xlane.f32.xlu0 %v645_v0  ;;  %v3388_v0 = vadd.f32 %v3025_v61, %v3208_v11 }
 0x1a2   :  { %v501_v3 = vmul.f32 0.015625, %v424_v5  ;;  %v576_v6 = vmul.f32 %v3345_v28, %v3345_v28 }
 0x1a3   :  { %v476_v11 = vsel %vm367_vm2, %v3388_v0, 0.0 }
 0x1a4   :  { %v3357_v55 = vsub.f32 %v3118_v14, %v501_v3  ;;  %v648_v9 = vsel %vm367_vm2, %v576_v6, 0.0 }
 0x1a5   :  { %v427_v17 = vpop.xlane.xlu1 %426  ;;  %649 = vadd.xlane.f32.xlu1 %v648_v9  ;;  %465 = vadd.xlane.f32.xlu0 %v464_v42 }
 0x1a6   :  { %v502_v21 = vmul.f32 0.015625, %v427_v17  ;;  %v577_v48 = vmul.f32 %v3357_v55, %v3357_v55 }
 0x1a8   :  { %v3369_v58 = vsub.f32 %v3123_v19, %v502_v21  ;;  %v651_v14 = vsel %vm367_vm2, %v577_v48, 0.0  ;;  %v473_v19 = vsel %vm367_vm2, %v3378_v52, 0.0 }
 0x1a9   :  { %652 = vadd.xlane.f32.xlu0 %v651_v14  ;;  %468 = vadd.xlane.f32.xlu1 %v467_v22 }
 0x1aa   :  { %v578_v36 = vmul.f32 %v3369_v58, %v3369_v58 }
 0x1ac   :  { %v654_v62 = vsel %vm367_vm2, %v578_v36, 0.0 }
 0x1ad   :  { %655 = vadd.xlane.f32.xlu1 %v654_v62  ;;  %471 = vadd.xlane.f32.xlu0 %v470_v33  ;;  %v3402_v62 = vadd.f32 %v3025_v61, %v3222_v27 }
 0x1af   :  { %v479_v61 = vsel %vm367_vm2, %v3402_v62, 0.0 }
 0x1b1   :  { %474 = vadd.xlane.f32.xlu1 %v473_v19 }
 0x1ea   :  { %v599_v38 = vpop.xlane.xlu0 %598 }
 0x1eb   :  { %v711_v47 = vmul.f32 0.015625, %v599_v38 }
 0x1ed   :  { %v749_v24 = vadd.f32 1e-05, %v711_v47 }
 0x1ee   :  { %v602_v56 = vpop.xlane.xlu1 %601  ;;  %v430_v49 = vpop.xlane.xlu0 %429 }
 0x1ef   :  { %2596 = vrsqrt.f32 %v749_v24  ;;  %v712_v51 = vmul.f32 0.015625, %v602_v56  ;;  %v503_v54 = vmul.f32 0.015625, %v430_v49 }
 0x1f1   :  { %v750_v60 = vadd.f32 1e-05, %v712_v51  ;;  %v3384_v1 = vsub.f32 %v3155_v13, %v503_v54 }
 0x1f2   :  { %v605_v5 = vpop.xlane.xlu0 %604  ;;  %v433_v3 = vpop.xlane.xlu1 %432 }
 0x1f3   :  { %2598 = vrsqrt.f32 %v750_v60  ;;  %v713_v6 = vmul.f32 0.015625, %v605_v5  ;;  %v504_v42 = vmul.f32 0.015625, %v433_v3  ;;  %v579_v9 = vmul.f32 %v3384_v1, %v3384_v1  ;;  %v3419_v5 = vld [vmem:[%s4329_s3] ss:$0 sm:$0xff] }
 0x1f5   :  { %v751_v17 = vadd.f32 1e-05, %v713_v6  ;;  %v3393_v21 = vsub.f32 %v3168_v23, %v504_v42  ;;  %v657_v48 = vsel %vm367_vm2, %v579_v9, 0.0 }
 0x1f6   :  { %v608_v13 = vpop.xlane.xlu1 %607  ;;  %v436_v22 = vpop.xlane.xlu0 %435  ;;  %658 = vadd.xlane.f32.xlu0 %v657_v48 }
 0x1f7   :  { %2600 = vrsqrt.f32 %v751_v17  ;;  %v714_v14 = vmul.f32 0.015625, %v608_v13  ;;  %v505_v36 = vmul.f32 0.015625, %v436_v22  ;;  %v580_v33 = vmul.f32 %v3393_v21, %v3393_v21 }
 0x1f9   :  { %v752_v23 = vadd.f32 1e-05, %v714_v14  ;;  %v3405_v19 = vsub.f32 %v3177_v41, %v505_v36  ;;  %v660_v38 = vsel %vm367_vm2, %v580_v33, 0.0 }
 0x1fa   :  { %v611_v47 = vpop.xlane.xlu0 %610  ;;  %v439_v24 = vpop.xlane.xlu1 %438  ;;  %661 = vadd.xlane.f32.xlu1 %v660_v38  ;;  %477 = vadd.xlane.f32.xlu0 %v476_v11 }
 0x1fb   :  { %2602 = vrsqrt.f32 %v752_v23  ;;  %v715_v56 = vmul.f32 0.015625, %v611_v47  ;;  %v506_v49 = vmul.f32 0.015625, %v439_v24  ;;  %v581_v51 = vmul.f32 %v3405_v19, %v3405_v19 }
 0x1fc   :  { %v2597_v54 = vpop.eup %2596 }
 0x1fd   :  { %v753_v27 = vadd.f32 1e-05, %v715_v56  ;;  %v3413_v41 = vsub.f32 %v3190_v29, %v506_v49  ;;  %v663_v60 = vsel %vm367_vm2, %v581_v51, 0.0  ;;  %v825_v3 = vmul.f32 %v2597_v54, %v3152_v10  ;;  %v3432_v10 = vld [vmem:[%s4330_s4] ss:$0 sm:$0xff] }
 0x1fe   :  { %v614_v6 = vpop.xlane.xlu1 %613  ;;  %v442_v42 = vpop.xlane.xlu0 %441  ;;  %664 = vadd.xlane.f32.xlu0 %v663_v60  ;;  %480 = vadd.xlane.f32.xlu1 %v479_v61 }
 0x1ff   :  { %2604 = vrsqrt.f32 %v753_v27  ;;  %v716_v9 = vmul.f32 0.015625, %v614_v6  ;;  %v507_v17 = vmul.f32 0.015625, %v442_v42  ;;  %v582_v29 = vmul.f32 %v3413_v41, %v3413_v41 }
 0x200   :  { %v2599_v48 = vpop.eup %2598  ;;  %v869_v13 = vmul.f32 %v3419_v5, %v825_v3 }
 0x201   :  { %v754_v22 = vadd.f32 1e-05, %v716_v9  ;;  %v3426_v11 = vsub.f32 %v3202_v7, %v507_v17  ;;  %v666_v14 = vsel %vm367_vm2, %v582_v29, 0.0  ;;  %v826_v36 = vmul.f32 %v2599_v48, %v3160_v18 }
 0x202   :  { %v617_v33 = vpop.xlane.xlu0 %616  ;;  %v445_v23 = vpop.xlane.xlu1 %444  ;;  %667 = vadd.xlane.f32.xlu1 %v666_v14  ;;  %v913_v49 = vadd.f32 %v3432_v10, %v869_v13 }
 0x203   :  { %2606 = vrsqrt.f32 %v754_v22  ;;  %v717_v38 = vmul.f32 0.015625, %v617_v33  ;;  %v508_v47 = vmul.f32 0.015625, %v445_v23  ;;  %v583_v24 = vmul.f32 %v3426_v11, %v3426_v11 }
 0x204   :  { %v2601_v7 = vpop.eup %2600  ;;  %v870_v56 = vmul.f32 %v3419_v5, %v826_v36  ;;  %v951_v29 = vmax.f32 %v913_v49, 0.0 }
 0x205   :  { %v755_v51 = vadd.f32 1e-05, %v717_v38  ;;  %v3440_v54 = vsub.f32 %v3216_v34, %v508_v47  ;;  %v669_v18 = vsel %vm367_vm2, %v583_v24, 0.0  ;;  %v827_v61 = vmul.f32 %v2601_v7, %v3171_v30 }
 0x206   :  { %v620_v27 = vpop.xlane.xlu1 %619  ;;  %v448_v60 = vpop.xlane.xlu0 %447  ;;  %670 = vadd.xlane.f32.xlu0 %v669_v18  ;;  %v914_v3 = vadd.f32 %v3432_v10, %v870_v56 }
 0x207   :  { %2608 = vrsqrt.f32 %v755_v51  ;;  %v718_v6 = vmul.f32 0.015625, %v620_v27  ;;  %v509_v42 = vmul.f32 0.015625, %v448_v60  ;;  %v584_v9 = vmul.f32 %v3440_v54, %v3440_v54 }
 0x208   :  { %v2603_v17 = vpop.eup %2602  ;;  %v952_v48 = vmax.f32 %v914_v3, 0.0  ;;  %v871_v34 = vmul.f32 %v3419_v5, %v827_v61 }
 0x209   :  { %v756_v13 = vadd.f32 1e-05, %v718_v6  ;;  %v3449_v22 = vsub.f32 %v3230_v37, %v509_v42  ;;  %v672_v30 = vsel %vm367_vm2, %v584_v9, 0.0  ;;  %v828_v14 = vmul.f32 %v2603_v17, %v3180_v43 }
 0x20a   :  { %v623_v36 = vpop.xlane.xlu0 %622  ;;  %v451_v33 = vpop.xlane.xlu1 %450  ;;  %673 = vadd.xlane.f32.xlu1 %v672_v30  ;;  %v989_v23 = vpack.c.bf16 %v952_v48, %v951_v29  ;;  %v915_v56 = vadd.f32 %v3432_v10, %v871_v34 }
 0x20b   :  { %2610 = vrsqrt.f32 %v756_v13  ;;  %v719_v38 = vmul.f32 0.015625, %v623_v36  ;;  %v510_v47 = vmul.f32 0.015625, %v451_v33  ;;  %v585_v24 = vmul.f32 %v3449_v22, %v3449_v22 }
 0x20c   :  { %v2605_v7 = vpop.eup %2604  ;;  %2494 = vmatmul.mubr.msk.bf16.vlgmr.msra.gmra.mxu1 %vm367_vm2, %v989_v23  ;;  %v872_v37 = vmul.f32 %v3419_v5, %v828_v14  ;;  %v953_v9 = vmax.f32 %v915_v56, 0.0 }
 0x20d   :  { %v757_v49 = vadd.f32 1e-05, %v719_v38  ;;  %v3459_v43 = vsub.f32 %v3242_v39, %v510_v47  ;;  %v675_v51 = vsel %vm367_vm2, %v585_v24, 0.0  ;;  %2497 = vmatprep.mubr.msk.bf16.mxu1 %vm2773_vm0, %v2772_v2  ;;  %v829_v18 = vmul.f32 %v2605_v7, %v3193_v12 }
 0x20e   :  { %v626_v61 = vpop.xlane.xlu1 %625  ;;  %v454_v27 = vpop.xlane.xlu0 %453  ;;  %676 = vadd.xlane.f32.xlu0 %v675_v51  ;;  %v916_v60 = vadd.f32 %v3432_v10, %v872_v37 }
 0x20f   :  { %2612 = vrsqrt.f32 %v757_v49  ;;  %v720_v3 = vmul.f32 0.015625, %v626_v61  ;;  %v511_v6 = vmul.f32 0.015625, %v454_v27  ;;  %v586_v42 = vmul.f32 %v3459_v43, %v3459_v43 }
 0x210   :  { %v2607_v39 = vpop.eup %2606  ;;  %v954_v17 = vmax.f32 %v916_v60, 0.0  ;;  %v873_v29 = vmul.f32 %v3419_v5, %v829_v18 }
 0x211   :  { %v758_v48 = vadd.f32 1e-05, %v720_v3  ;;  %v3470_v34 = vsub.f32 %v3257_v16, %v511_v6  ;;  %v678_v12 = vsel %vm367_vm2, %v586_v42, 0.0  ;;  %v830_v13 = vmul.f32 %v2607_v39, %v3205_v31 }
 0x212   :  { %v629_v30 = vpop.xlane.xlu0 %628  ;;  %v457_v14 = vpop.xlane.xlu1 %456  ;;  %679 = vadd.xlane.f32.xlu1 %v678_v12  ;;  %v990_v36 = vpack.c.bf16 %v954_v17, %v953_v9  ;;  %v917_v24 = vadd.f32 %v3432_v10, %v873_v29 }
 0x213   :  { %2614 = vrsqrt.f32 %v758_v48  ;;  %v721_v33 = vmul.f32 0.015625, %v629_v30  ;;  %v512_v23 = vmul.f32 0.015625, %v457_v14  ;;  %v587_v38 = vmul.f32 %v3470_v34, %v3470_v34 }
 0x214   :  { %v2609_v47 = vpop.eup %2608  ;;  %2498 = vmatmul.mubr.msk.bf16.gmra.mxu1 %vm367_vm2, %v990_v36  ;;  %v874_v16 = vmul.f32 %v3419_v5, %v830_v13  ;;  %v955_v3 = vmax.f32 %v917_v24, 0.0 }
 0x215   :  { %v759_v7 = vadd.f32 1e-05, %v721_v33  ;;  %v3480_v31 = vsub.f32 %v3273_v63, %v512_v23  ;;  %v681_v37 = vsel %vm367_vm2, %v587_v38, 0.0  ;;  %2501 = vmatprep.mubr.msk.bf16.mxu1 %vm2773_vm0, %v2772_v2  ;;  %v831_v56 = vmul.f32 %v2609_v47, %v3219_v25 }
 0x216   :  { %v632_v49 = vpop.xlane.xlu1 %631  ;;  %v460_v51 = vpop.xlane.xlu0 %459  ;;  %682 = vadd.xlane.f32.xlu0 %v681_v37  ;;  %v918_v18 = vadd.f32 %v3432_v10, %v874_v16 }
 0x217   :  { %2616 = vrsqrt.f32 %v759_v7  ;;  %v722_v61 = vmul.f32 0.015625, %v632_v49  ;;  %v513_v27 = vmul.f32 0.015625, %v460_v51  ;;  %v588_v60 = vmul.f32 %v3480_v31, %v3480_v31 }
 0x218   :  { %v2611_v63 = vpop.eup %2610  ;;  %v956_v6 = vmax.f32 %v918_v18, 0.0  ;;  %v875_v42 = vmul.f32 %v3419_v5, %v831_v56 }
 0x219   :  { %v760_v39 = vadd.f32 1e-05, %v722_v61  ;;  %v3491_v9 = vsub.f32 %v3289_v8, %v513_v27  ;;  %v684_v25 = vsel %vm367_vm2, %v588_v60, 0.0  ;;  %v832_v17 = vmul.f32 %v2611_v63, %v3233_v26 }
 0x21a   :  { %v635_v29 = vpop.xlane.xlu0 %634  ;;  %v463_v48 = vpop.xlane.xlu1 %462  ;;  %685 = vadd.xlane.f32.xlu1 %v684_v25  ;;  %v991_v12 = vpack.c.bf16 %v956_v6, %v955_v3  ;;  %v919_v33 = vadd.f32 %v3432_v10, %v875_v42 }
 0x21b   :  { %2618 = vrsqrt.f32 %v760_v39  ;;  %v723_v13 = vmul.f32 0.015625, %v635_v29  ;;  %v514_v30 = vmul.f32 0.015625, %v463_v48  ;;  %v589_v14 = vmul.f32 %v3491_v9, %v3491_v9 }
 0x21c   :  { %v2613_v36 = vpop.eup %2612  ;;  %2502 = vmatmul.mubr.msk.bf16.gmra.mxu1 %vm367_vm2, %v991_v12  ;;  %v876_v8 = vmul.f32 %v3419_v5, %v832_v17  ;;  %v957_v49 = vmax.f32 %v919_v33, 0.0 }
 0x21d   :  { %v761_v23 = vadd.f32 1e-05, %v723_v13  ;;  %v3501_v26 = vsub.f32 %v3305_v59, %v514_v30  ;;  %v687_v38 = vsel %vm367_vm2, %v589_v14, 0.0  ;;  %2505 = vmatprep.mubr.msk.bf16.mxu1 %vm2773_vm0, %v2772_v2  ;;  %v833_v47 = vmul.f32 %v2613_v36, %v3248_v57 }
 0x21e   :  { %v638_v16 = vpop.xlane.xlu1 %637  ;;  %688 = vadd.xlane.f32.xlu0 %v687_v38  ;;  %v920_v24 = vadd.f32 %v3432_v10, %v876_v8 }
 0x21f   :  { %2620 = vrsqrt.f32 %v761_v23  ;;  %v724_v7 = vmul.f32 0.015625, %v638_v16  ;;  %v590_v37 = vmul.f32 %v3501_v26, %v3501_v26  ;;  %v877_v56 = vmul.f32 %v3419_v5, %v833_v47 }
 0x220   :  { %v2615_v59 = vpop.eup %2614  ;;  %v958_v51 = vmax.f32 %v920_v24, 0.0 }
 0x221   :  { %v762_v18 = vadd.f32 1e-05, %v724_v7  ;;  %v690_v61 = vsel %vm367_vm2, %v590_v37, 0.0  ;;  %v834_v27 = vmul.f32 %v2615_v59, %v3264_v15  ;;  %v921_v63 = vadd.f32 %v3432_v10, %v877_v56 }
 0x222   :  { %v641_v57 = vpop.xlane.xlu0 %640  ;;  %691 = vadd.xlane.f32.xlu1 %v690_v61  ;;  %v992_v60 = vpack.c.bf16 %v958_v51, %v957_v49 }
 0x223   :  { %2622 = vrsqrt.f32 %v762_v18  ;;  %v725_v3 = vmul.f32 0.015625, %v641_v57  ;;  %v878_v6 = vmul.f32 %v3419_v5, %v834_v27  ;;  %v959_v29 = vmax.f32 %v921_v63, 0.0 }
 0x224   :  { %v2617_v42 = vpop.eup %2616  ;;  %2506 = vmatmul.mubr.msk.bf16.gmra.mxu1 %vm367_vm2, %v992_v60 }
 0x225   :  { %v763_v39 = vadd.f32 1e-05, %v725_v3  ;;  %2509 = vmatprep.mubr.msk.bf16.mxu1 %vm2773_vm0, %v2772_v2  ;;  %v922_v25 = vadd.f32 %v3432_v10, %v878_v6  ;;  %v835_v15 = vmul.f32 %v2617_v42, %v3280_v4 }
 0x226   :  { %v644_v17 = vpop.xlane.xlu1 %643 }
 0x227   :  { %2624 = vrsqrt.f32 %v763_v39  ;;  %v726_v48 = vmul.f32 0.015625, %v644_v17  ;;  %v960_v12 = vmax.f32 %v922_v25, 0.0  ;;  %v879_v13 = vmul.f32 %v3419_v5, %v835_v15 }
 0x228   :  { %v2619_v30 = vpop.eup %2618 }
 0x229   :  { %v764_v14 = vadd.f32 1e-05, %v726_v48  ;;  %v993_v36 = vpack.c.bf16 %v960_v12, %v959_v29  ;;  %v836_v8 = vmul.f32 %v2619_v30, %v3296_v46  ;;  %v923_v23 = vadd.f32 %v3432_v10, %v879_v13 }
 0x22a   :  { %v647_v33 = vpop.xlane.xlu0 %646 }
 0x22b   :  { %2626 = vrsqrt.f32 %v764_v14  ;;  %v727_v38 = vmul.f32 0.015625, %v647_v33  ;;  %v880_v47 = vmul.f32 %v3419_v5, %v836_v8  ;;  %v961_v56 = vmax.f32 %v923_v23, 0.0 }
 0x22c   :  { %v2621_v4 = vpop.eup %2620  ;;  %2510 = vmatmul.mubr.msk.bf16.gmra.mxu1 %vm367_vm2, %v993_v36 }
 0x22d   :  { %v765_v16 = vadd.f32 1e-05, %v727_v38  ;;  %2513 = vmatprep.mubr.msk.bf16.mxu1 %vm2773_vm0, %v2772_v2  ;;  %v924_v24 = vadd.f32 %v3432_v10, %v880_v47  ;;  %v837_v7 = vmul.f32 %v2621_v4, %v3309_v44 }
 0x22e   :  { %v650_v37 = vpop.xlane.xlu1 %649  ;;  %v466_v46 = vpop.xlane.xlu0 %465 }
 0x22f   :  { %2628 = vrsqrt.f32 %v765_v16  ;;  %v728_v59 = vmul.f32 0.015625, %v650_v37  ;;  %v515_v49 = vmul.f32 0.015625, %v466_v46  ;;  %v962_v51 = vmax.f32 %v924_v24, 0.0 }
 0x230   :  { %v2623_v18 = vpop.eup %2622  ;;  %v881_v61 = vmul.f32 %v3419_v5, %v837_v7 }
 0x231   :  { %v766_v27 = vadd.f32 1e-05, %v728_v59  ;;  %v3531_v57 = vsub.f32 %v3342_v50, %v515_v49  ;;  %v994_v60 = vpack.c.bf16 %v962_v51, %v961_v56  ;;  %v838_v63 = vmul.f32 %v2623_v18, %v3317_v53 }
 0x232   :  { %v653_v3 = vpop.xlane.xlu0 %652  ;;  %v469_v6 = vpop.xlane.xlu1 %468  ;;  %v925_v17 = vadd.f32 %v3432_v10, %v881_v61 }
 0x233   :  { %2630 = vrsqrt.f32 %v766_v27  ;;  %v729_v44 = vmul.f32 0.015625, %v653_v3  ;;  %v516_v42 = vmul.f32 0.015625, %v469_v6  ;;  %v591_v39 = vmul.f32 %v3531_v57, %v3531_v57 }
 0x234   :  { %v2625_v25 = vpop.eup %2624  ;;  %2514 = vmatmul.mubr.msk.bf16.gmra.mxu1 %vm367_vm2, %v994_v60  ;;  %v882_v15 = vmul.f32 %v3419_v5, %v838_v63  ;;  %v963_v33 = vmax.f32 %v925_v17, 0.0 }
 0x235   :  { %v767_v50 = vadd.f32 1e-05, %v729_v44  ;;  %v3540_v29 = vsub.f32 %v3354_v32, %v516_v42  ;;  %v693_v53 = vsel %vm367_vm2, %v591_v39, 0.0  ;;  %2517 = vmatprep.mubr.msk.bf16.mxu1 %vm2773_vm0, %v2772_v2  ;;  %v839_v48 = vmul.f32 %v2625_v25, %v3323_v45 }
 0x236   :  { %v656_v12 = vpop.xlane.xlu1 %655  ;;  %v472_v13 = vpop.xlane.xlu0 %471  ;;  %694 = vadd.xlane.f32.xlu0 %v693_v53  ;;  %v926_v30 = vadd.f32 %v3432_v10, %v882_v15 }
 0x237   :  { %2632 = vrsqrt.f32 %v767_v50  ;;  %v730_v14 = vmul.f32 0.015625, %v656_v12  ;;  %v517_v36 = vmul.f32 0.015625, %v472_v13  ;;  %v592_v8 = vmul.f32 %v3540_v29, %v3540_v29 }
 0x238   :  { %v2627_v32 = vpop.eup %2626  ;;  %v964_v23 = vmax.f32 %v926_v30, 0.0  ;;  %v883_v38 = vmul.f32 %v3419_v5, %v839_v48 }
 0x239   :  { %v768_v47 = vadd.f32 1e-05, %v730_v14  ;;  %v3551_v4 = vsub.f32 %v3366_v20, %v517_v36  ;;  %v696_v45 = vsel %vm367_vm2, %v592_v8, 0.0  ;;  %v840_v16 = vmul.f32 %v2627_v32, %v3329_v35 }
 0x23a   :  { %v475_v24 = vpop.xlane.xlu1 %474  ;;  %697 = vadd.xlane.f32.xlu1 %v696_v45  ;;  %v995_v7 = vpack.c.bf16 %v964_v23, %v963_v33  ;;  %v927_v37 = vadd.f32 %v3432_v10, %v883_v38 }
 0x23b   :  { %2634 = vrsqrt.f32 %v768_v47  ;;  %v518_v46 = vmul.f32 0.015625, %v475_v24  ;;  %v593_v56 = vmul.f32 %v3551_v4, %v3551_v4  ;;  %v884_v59 = vmul.f32 %v3419_v5, %v840_v16 }
 0x23c   :  { %v2629_v49 = vpop.eup %2628  ;;  %2518 = vmatmul.mubr.msk.bf16.gmra.mxu1 %vm367_vm2, %v995_v7  ;;  %v965_v27 = vmax.f32 %v927_v37, 0.0 }
 0x23d   :  { %v3561_v20 = vsub.f32 %v3378_v52, %v518_v46  ;;  %v699_v35 = vsel %vm367_vm2, %v593_v56, 0.0  ;;  %2521 = vmatprep.mubr.msk.bf16.mxu1 %vm2773_vm0, %v2772_v2  ;;  %v928_v51 = vadd.f32 %v3432_v10, %v884_v59  ;;  %v841_v18 = vmul.f32 %v2629_v49, %v3335_v40 }
 0x23e   :  { %700 = vadd.xlane.f32.xlu0 %v699_v35 }
 0x23f   :  { %v594_v61 = vmul.f32 %v3561_v20, %v3561_v20  ;;  %v966_v60 = vmax.f32 %v928_v51, 0.0  ;;  %v885_v63 = vmul.f32 %v3419_v5, %v841_v18 }
 0x240   :  { %v2631_v3 = vpop.eup %2630 }
 0x241   :  { %v702_v52 = vsel %vm367_vm2, %v594_v61, 0.0  ;;  %v996_v6 = vpack.c.bf16 %v966_v60, %v965_v27  ;;  %v842_v44 = vmul.f32 %v2631_v3, %v3345_v28  ;;  %v929_v39 = vadd.f32 %v3432_v10, %v885_v63 }
 0x242   :  { %703 = vadd.xlane.f32.xlu1 %v702_v52 }
 0x243   :  { %v886_v42 = vmul.f32 %v3419_v5, %v842_v44  ;;  %v967_v17 = vmax.f32 %v929_v39, 0.0 }
 0x244   :  { %v2633_v40 = vpop.eup %2632  ;;  %2522 = vmatmul.mubr.msk.bf16.gmra.mxu1 %vm367_vm2, %v996_v6 }
 0x245   :  { %2525 = vmatprep.mubr.msk.bf16.mxu1 %vm2773_vm0, %v2772_v2  ;;  %v930_v25 = vadd.f32 %v3432_v10, %v886_v42  ;;  %v843_v15 = vmul.f32 %v2633_v40, %v3357_v55 }
 0x247   :  { %v968_v50 = vmax.f32 %v930_v25, 0.0  ;;  %v887_v53 = vmul.f32 %v3419_v5, %v843_v15 }
 0x248   :  { %v2635_v28 = vpop.eup %2634 }
 0x249   :  { %v997_v48 = vpack.c.bf16 %v968_v50, %v967_v17  ;;  %v844_v12 = vmul.f32 %v2635_v28, %v3369_v58  ;;  %v931_v30 = vadd.f32 %v3432_v10, %v887_v53 }
 0x24b   :  { %v888_v13 = vmul.f32 %v3419_v5, %v844_v12  ;;  %v969_v55 = vmax.f32 %v931_v30, 0.0 }
 0x24c   :  { %2526 = vmatmul.mubr.msk.bf16.gmra.mxu1 %vm367_vm2, %v997_v48 }
 0x24d   :  { %2529 = vmatprep.mubr.msk.bf16.mxu1 %vm2773_vm0, %v2772_v2  ;;  %v932_v14 = vadd.f32 %v3432_v10, %v888_v13 }
 0x24f   :  { %v970_v36 = vmax.f32 %v932_v14, 0.0 }
 0x251   :  { %v998_v8 = vpack.c.bf16 %v970_v36, %v969_v55 }
 0x254   :  { %2530 = vmatmul.mubr.msk.bf16.gmra.mxu1 %vm367_vm2, %v998_v8 }
 0x255   :  { %2533 = vmatprep.mubr.msk.bf16.mxu1 %vm2773_vm0, %v2772_v2 }
 0x27f   :  { %v659_v58 = vpop.xlane.xlu0 %658 }
 0x280   :  { %v731_v32 = vmul.f32 0.015625, %v659_v58 }
 0x282   :  { %v769_v33 = vadd.f32 1e-05, %v731_v32 }
 0x283   :  { %v662_v23 = vpop.xlane.xlu1 %661  ;;  %v478_v38 = vpop.xlane.xlu0 %477 }
 0x284   :  { %2636 = vrsqrt.f32 %v769_v33  ;;  %v732_v47 = vmul.f32 0.015625, %v662_v23  ;;  %v519_v45 = vmul.f32 0.015625, %v478_v38 }
 0x286   :  { %v770_v16 = vadd.f32 1e-05, %v732_v47  ;;  %v3592_v24 = vsub.f32 %v3388_v0, %v519_v45 }
 0x287   :  { %v665_v7 = vpop.xlane.xlu0 %664  ;;  %v481_v37 = vpop.xlane.xlu1 %480 }
 0x288   :  { %2638 = vrsqrt.f32 %v770_v16  ;;  %v733_v46 = vmul.f32 0.015625, %v665_v7  ;;  %v520_v56 = vmul.f32 0.015625, %v481_v37  ;;  %v595_v59 = vmul.f32 %v3592_v24, %v3592_v24 }
 0x28a   :  { %v771_v49 = vadd.f32 1e-05, %v733_v46  ;;  %v3597_v35 = vsub.f32 %v3402_v62, %v520_v56  ;;  %v705_v51 = vsel %vm367_vm2, %v595_v59, 0.0 }
 0x28b   :  { %706 = vadd.xlane.f32.xlu0 %v705_v51  ;;  %v668_v18 = vpop.xlane.xlu1 %667 }
 0x28c   :  { %2640 = vrsqrt.f32 %v771_v49  ;;  %v734_v61 = vmul.f32 0.015625, %v668_v18  ;;  %v596_v0 = vmul.f32 %v3597_v35, %v3597_v35 }
 0x28e   :  { %v772_v27 = vadd.f32 1e-05, %v734_v61  ;;  %v708_v60 = vsel %vm367_vm2, %v596_v0, 0.0 }
 0x28f   :  { %v671_v63 = vpop.xlane.xlu0 %670  ;;  %709 = vadd.xlane.f32.xlu1 %v708_v60 }
 0x290   :  { %2642 = vrsqrt.f32 %v772_v27  ;;  %v735_v3 = vmul.f32 0.015625, %v671_v63 }
 0x291   :  { %v2637_v52 = vpop.eup %2636 }
 0x292   :  { %v773_v6 = vadd.f32 1e-05, %v735_v3  ;;  %v845_v62 = vmul.f32 %v2637_v52, %v3384_v1 }
 0x293   :  { %v674_v44 = vpop.xlane.xlu1 %673 }
 0x294   :  { %2644 = vrsqrt.f32 %v773_v6  ;;  %v736_v42 = vmul.f32 0.015625, %v674_v44  ;;  %v889_v39 = vmul.f32 %v3419_v5, %v845_v62 }
 0x295   :  { %v2639_v40 = vpop.eup %2638 }
 0x296   :  { %v774_v25 = vadd.f32 1e-05, %v736_v42  ;;  %v846_v15 = vmul.f32 %v2639_v40, %v3393_v21  ;;  %v933_v50 = vadd.f32 %v3432_v10, %v889_v39 }
 0x297   :  { %v677_v17 = vpop.xlane.xlu0 %676 }
 0x298   :  { %2646 = vrsqrt.f32 %v774_v25  ;;  %v737_v53 = vmul.f32 0.015625, %v677_v17  ;;  %v890_v28 = vmul.f32 %v3419_v5, %v846_v15  ;;  %v971_v14 = vmax.f32 %v933_v50, 0.0 }
 0x299   :  { %v2641_v48 = vpop.eup %2640 }
 0x29a   :  { %v775_v12 = vadd.f32 1e-05, %v737_v53  ;;  %v934_v1 = vadd.f32 %v3432_v10, %v890_v28  ;;  %v847_v13 = vmul.f32 %v2641_v48, %v3405_v19 }
 0x29b   :  { %v680_v30 = vpop.xlane.xlu1 %679 }
 0x29c   :  { %2648 = vrsqrt.f32 %v775_v12  ;;  %v738_v55 = vmul.f32 0.015625, %v680_v30  ;;  %v972_v36 = vmax.f32 %v934_v1, 0.0  ;;  %v891_v21 = vmul.f32 %v3419_v5, %v847_v13 }
 0x29d   :  { %v2643_v8 = vpop.eup %2642 }
 0x29e   :  { %v776_v58 = vadd.f32 1e-05, %v738_v55  ;;  %v999_v32 = vpack.c.bf16 %v972_v36, %v971_v14  ;;  %v848_v33 = vmul.f32 %v2643_v8, %v3413_v41  ;;  %v935_v38 = vadd.f32 %v3432_v10, %v891_v21 }
 0x29f   :  { %v683_v23 = vpop.xlane.xlu0 %682 }
 0x2a0   :  { %2650 = vrsqrt.f32 %v776_v58  ;;  %v739_v47 = vmul.f32 0.015625, %v683_v23  ;;  %2534 = vmatmul.mubr.msk.bf16.gmra.mxu1 %vm367_vm2, %v999_v32  ;;  %v892_v19 = vmul.f32 %v3419_v5, %v848_v33  ;;  %v973_v41 = vmax.f32 %v935_v38, 0.0 }
 0x2a1   :  { %v2645_v45 = vpop.eup %2644  ;;  %2537 = vmatprep.mubr.msk.bf16.mxu1 %vm2773_vm0, %v2772_v2 }
 0x2a2   :  { %v777_v16 = vadd.f32 1e-05, %v739_v47  ;;  %v936_v7 = vadd.f32 %v3432_v10, %v892_v19  ;;  %v849_v37 = vmul.f32 %v2645_v45, %v3426_v11 }
 0x2a3   :  { %v686_v46 = vpop.xlane.xlu1 %685 }
 0x2a4   :  { %2652 = vrsqrt.f32 %v777_v16  ;;  %v740_v56 = vmul.f32 0.015625, %v686_v46  ;;  %v974_v59 = vmax.f32 %v936_v7, 0.0  ;;  %v893_v49 = vmul.f32 %v3419_v5, %v849_v37 }
 0x2a5   :  { %v2647_v51 = vpop.eup %2646 }
 0x2a6   :  { %v778_v18 = vadd.f32 1e-05, %v740_v56  ;;  %v1000_v61 = vpack.c.bf16 %v974_v59, %v973_v41  ;;  %v850_v0 = vmul.f32 %v2647_v51, %v3440_v54  ;;  %v937_v60 = vadd.f32 %v3432_v10, %v893_v49 }
 0x2a7   :  { %v689_v27 = vpop.xlane.xlu0 %688 }
 0x2a8   :  { %2654 = vrsqrt.f32 %v778_v18  ;;  %v741_v63 = vmul.f32 0.015625, %v689_v27  ;;  %2538 = vmatmul.mubr.msk.bf16.gmra.mxu1 %vm367_vm2, %v1000_v61  ;;  %v894_v11 = vmul.f32 %v3419_v5, %v850_v0  ;;  %v975_v54 = vmax.f32 %v937_v60, 0.0 }
 0x2a9   :  { %v2649_v3 = vpop.eup %2648  ;;  %2541 = vmatprep.mubr.msk.bf16.mxu1 %vm2773_vm0, %v2772_v2 }
 0x2aa   :  { %v779_v52 = vadd.f32 1e-05, %v741_v63  ;;  %v938_v6 = vadd.f32 %v3432_v10, %v894_v11  ;;  %v851_v62 = vmul.f32 %v2649_v3, %v3449_v22 }
 0x2ab   :  { %v692_v44 = vpop.xlane.xlu1 %691 }
 0x2ac   :  { %2656 = vrsqrt.f32 %v779_v52  ;;  %v742_v42 = vmul.f32 0.015625, %v692_v44  ;;  %v976_v39 = vmax.f32 %v938_v6, 0.0  ;;  %v895_v40 = vmul.f32 %v3419_v5, %v851_v62 }
 0x2ad   :  { %v2651_v25 = vpop.eup %2650 }
 0x2ae   :  { %v780_v15 = vadd.f32 1e-05, %v742_v42  ;;  %v1001_v17 = vpack.c.bf16 %v976_v39, %v975_v54  ;;  %v852_v50 = vmul.f32 %v2651_v25, %v3459_v43  ;;  %v939_v28 = vadd.f32 %v3432_v10, %v895_v40 }
 0x2b0   :  { %2658 = vrsqrt.f32 %v780_v15  ;;  %2542 = vmatmul.mubr.msk.bf16.gmra.mxu1 %vm367_vm2, %v1001_v17  ;;  %v896_v53 = vmul.f32 %v3419_v5, %v852_v50  ;;  %v977_v1 = vmax.f32 %v939_v28, 0.0 }
 0x2b1   :  { %v2653_v22 = vpop.eup %2652  ;;  %2545 = vmatprep.mubr.msk.bf16.mxu1 %vm2773_vm0, %v2772_v2 }
 0x2b2   :  { %v940_v48 = vadd.f32 %v3432_v10, %v896_v53  ;;  %v853_v12 = vmul.f32 %v2653_v22, %v3470_v34 }
 0x2b4   :  { %v978_v13 = vmax.f32 %v940_v48, 0.0  ;;  %v897_v30 = vmul.f32 %v3419_v5, %v853_v12 }
 0x2b5   :  { %v2655_v43 = vpop.eup %2654 }
 0x2b6   :  { %v1002_v14 = vpack.c.bf16 %v978_v13, %v977_v1  ;;  %v854_v55 = vmul.f32 %v2655_v43, %v3480_v31  ;;  %v941_v21 = vadd.f32 %v3432_v10, %v897_v30 }
 0x2b8   :  { %2546 = vmatmul.mubr.msk.bf16.gmra.mxu1 %vm367_vm2, %v1002_v14  ;;  %v898_v36 = vmul.f32 %v3419_v5, %v854_v55  ;;  %v979_v32 = vmax.f32 %v941_v21, 0.0 }
 0x2b9   :  { %v2657_v8 = vpop.eup %2656  ;;  %2549 = vmatprep.mubr.msk.bf16.mxu1 %vm2773_vm0, %v2772_v2 }
 0x2ba   :  { %v942_v34 = vadd.f32 %v3432_v10, %v898_v36  ;;  %v855_v58 = vmul.f32 %v2657_v8, %v3491_v9 }
 0x2bc   :  { %v980_v33 = vmax.f32 %v942_v34, 0.0  ;;  %v899_v23 = vmul.f32 %v3419_v5, %v855_v58 }
 0x2bd   :  { %v2659_v38 = vpop.eup %2658 }
 0x2be   :  { %v1003_v31 = vpack.c.bf16 %v980_v33, %v979_v32  ;;  %v856_v47 = vmul.f32 %v2659_v38, %v3501_v26  ;;  %v943_v7 = vadd.f32 %v3432_v10, %v899_v23 }
 0x2bf   :  { %v695_v19 = vpop.xlane.xlu0 %694 }
 0x2c0   :  { %v743_v45 = vmul.f32 0.015625, %v695_v19  ;;  %2550 = vmatmul.mubr.msk.bf16.gmra.mxu1 %vm367_vm2, %v1003_v31  ;;  %v900_v16 = vmul.f32 %v3419_v5, %v856_v47  ;;  %v981_v56 = vmax.f32 %v943_v7, 0.0 }
 0x2c1   :  { %2553 = vmatprep.mubr.msk.bf16.mxu1 %vm2773_vm0, %v2772_v2 }
 0x2c2   :  { %v781_v9 = vadd.f32 1e-05, %v743_v45  ;;  %v944_v37 = vadd.f32 %v3432_v10, %v900_v16 }
 0x2c3   :  { %v698_v46 = vpop.xlane.xlu1 %697 }
 0x2c4   :  { %2660 = vrsqrt.f32 %v781_v9  ;;  %v744_v41 = vmul.f32 0.015625, %v698_v46  ;;  %v982_v59 = vmax.f32 %v944_v37, 0.0  ;;  %v3692_v37 = vld [vmem:[%s4332_s6] ss:$0 sm:$0xff] }
 0x2c6   :  { %v782_v26 = vadd.f32 1e-05, %v744_v41  ;;  %v1004_v49 = vpack.c.bf16 %v982_v59, %v981_v56 }
 0x2c7   :  { %v701_v51 = vpop.xlane.xlu0 %700 }
 0x2c8   :  { %2662 = vrsqrt.f32 %v782_v26  ;;  %v745_v18 = vmul.f32 0.015625, %v701_v51  ;;  %2554 = vmatmul.mubr.msk.bf16.gmra.mxu1 %vm367_vm2, %v1004_v49 }
 0x2c9   :  { %2557 = vmatprep.mubr.msk.bf16.mxu1 %vm2773_vm0, %v2772_v2 }
 0x2ca   :  { %v783_v61 = vadd.f32 1e-05, %v745_v18 }
 0x2cb   :  { %v704_v0 = vpop.xlane.xlu1 %703 }
 0x2cc   :  { %2664 = vrsqrt.f32 %v783_v61  ;;  %v3657_v27 = vpop.f32.mrf.mxu1  ;;  %v746_v60 = vmul.f32 0.015625, %v704_v0 }
 0x2ce   :  { %v784_v63 = vadd.f32 1e-05, %v746_v60  ;;  %v2495_v11 = vpop.f32.mrf.mxu1 }
 0x2d0   :  { %2666 = vrsqrt.f32 %v784_v63  ;;  %v3659_v3 = vpop.f32.mrf.mxu1 }
 0x2d1   :  { %v2661_v52 = vpop.eup %2660 }
 0x2d2   :  { %v2496_v6 = vpop.f32.mrf.mxu1  ;;  %v857_v62 = vmul.f32 %v2661_v52, %v3531_v57 }
 0x2d4   :  { %v3662_v44 = vpop.f32.mrf.mxu1  ;;  %v901_v54 = vmul.f32 %v3419_v5, %v857_v62 }
 0x2d5   :  { %v2663_v42 = vpop.eup %2662 }
 0x2d6   :  { %v2499_v39 = vpop.f32.mrf.mxu1  ;;  %v858_v40 = vmul.f32 %v2663_v42, %v3540_v29  ;;  %v945_v17 = vadd.f32 %v3432_v10, %v901_v54 }
 0x2d8   :  { %v3666_v25 = vpop.f32.mrf.mxu1  ;;  %v902_v15 = vmul.f32 %v3419_v5, %v858_v40  ;;  %v983_v48 = vmax.f32 %v945_v17, 0.0 }
 0x2d9   :  { %v2665_v50 = vpop.eup %2664 }
 0x2da   :  { %v2500_v53 = vpop.f32.mrf.mxu1  ;;  %v946_v28 = vadd.f32 %v3432_v10, %v902_v15  ;;  %v859_v57 = vmul.f32 %v2665_v50, %v3551_v4 }
 0x2dc   :  { %v3672_v22 = vpop.f32.mrf.mxu1  ;;  %v984_v12 = vmax.f32 %v946_v28, 0.0  ;;  %v903_v1 = vmul.f32 %v3419_v5, %v859_v57 }
 0x2dd   :  { %v2667_v13 = vpop.eup %2666 }
 0x2de   :  { %v2503_v29 = vpop.f32.mrf.mxu1  ;;  %v1005_v30 = vpack.c.bf16 %v984_v12, %v983_v48  ;;  %v860_v43 = vmul.f32 %v2667_v13, %v3561_v20  ;;  %v947_v36 = vadd.f32 %v3432_v10, %v903_v1 }
 0x2e0   :  { %v3676_v14 = vpop.f32.mrf.mxu1  ;;  %2558 = vmatmul.mubr.msk.bf16.gmra.mxu1 %vm367_vm2, %v1005_v30  ;;  %v904_v55 = vmul.f32 %v3419_v5, %v860_v43  ;;  %v985_v34 = vmax.f32 %v947_v36, 0.0 }
 0x2e1   :  { %2561 = vmatprep.mubr.msk.bf16.mxu1 %vm2773_vm0, %v2772_v2 }
 0x2e2   :  { %v2504_v4 = vpop.f32.mrf.mxu1  ;;  %v948_v21 = vadd.f32 %v3432_v10, %v904_v55 }
 0x2e4   :  { %v3684_v8 = vpop.f32.mrf.mxu1  ;;  %v986_v58 = vmax.f32 %v948_v21, 0.0 }
 0x2e6   :  { %v2507_v32 = vpop.f32.mrf.mxu1  ;;  %v1006_v20 = vpack.c.bf16 %v986_v58, %v985_v34  ;;  %v3745_v34 = vadd.f32 %v3692_v37, %v3684_v8  ;;  %v2748_v8 = vld [vmem:[%s4329_s3] ss:$0 sm:$0xff] }
 0x2e8   :  { %v1165_v33 = vpop.f32.mrf.mxu1  ;;  %2562 = vmatmul.mubr.msk.bf16.gmra.mxu1 %vm367_vm2, %v1006_v20  ;;  %v3751_v20 = vadd.f32 %v3692_v37, %v3676_v14 }
 0x2e9   :  { %2565 = vmatprep.mubr.msk.bf16.mxu1 %vm2773_vm0, %v2772_v2  ;;  %v3739_v4 = vadd.f32 %v3692_v37, %v1165_v33  ;;  %v1309_v33 = vsel %vm122_vm1, %v3745_v34, 0.0 }
 0x2ea   :  { %v2508_v5 = vpop.f32.mrf.mxu1  ;;  %v1306_v14 = vsel %vm122_vm1, %v3751_v20, 0.0 }
 0x2eb   :  { %v1312_v58 = vsel %vm122_vm1, %v3739_v4, 0.0 }
 0x2ec   :  { %v1170_v23 = vpop.f32.mrf.mxu1 }
 0x2ed   :  { %v3734_v43 = vadd.f32 %v3692_v37, %v1170_v23 }
 0x2ee   :  { %v2511_v38 = vpop.f32.mrf.mxu1 }
 0x2ef   :  { %v1315_v21 = vsel %vm122_vm1, %v3734_v43, 0.0 }
 0x2f0   :  { %v1173_v31 = vpop.f32.mrf.mxu1 }
 0x2f1   :  { %v3729_v57 = vadd.f32 %v3692_v37, %v1173_v31  ;;  %v3761_v31 = vadd.f32 %v3692_v37, %v3672_v22 }
 0x2f2   :  { %v2512_v47 = vpop.f32.mrf.mxu1 }
 0x2f3   :  { %v1318_v36 = vsel %vm122_vm1, %v3729_v57, 0.0 }
 0x2f4   :  { %v1178_v19 = vpop.f32.mrf.mxu1 }
 0x2f5   :  { %v3722_v40 = vadd.f32 %v3692_v37, %v1178_v19 }
 0x2f6   :  { %v2515_v45 = vpop.f32.mrf.mxu1 }
 0x2f7   :  { %v1321_v12 = vsel %vm122_vm1, %v3722_v40, 0.0 }
 0x2f8   :  { %v1181_v10 = vpop.f32.mrf.mxu1 }
 0x2f9   :  { %v3715_v62 = vadd.f32 %v3692_v37, %v1181_v10 }
 0x2fa   :  { %v2516_v16 = vpop.f32.mrf.mxu1 }
 0x2fb   :  { %v1324_v15 = vsel %vm122_vm1, %v3715_v62, 0.0  ;;  %v1303_v16 = vsel %vm122_vm1, %v3761_v31, 0.0 }
 0x2fc   :  { %v1186_v7 = vpop.f32.mrf.mxu1 }
 0x2fd   :  { %v3708_v63 = vadd.f32 %v3692_v37, %v1186_v7 }
 0x2fe   :  { %v2519_v9 = vpop.f32.mrf.mxu1 }
 0x2ff   :  { %v1327_v54 = vsel %vm122_vm1, %v3708_v63, 0.0 }
 0x300   :  { %v1189_v46 = vpop.f32.mrf.mxu1 }
 0x301   :  { %v3695_v41 = vadd.f32 %v3692_v37, %v1189_v46 }
 0x302   :  { %v2520_v56 = vpop.f32.mrf.mxu1 }
 0x303   :  { %v1330_v59 = vsel %vm122_vm1, %v3695_v41, 0.0 }
 0x304   :  { %v1194_v26 = vpop.f32.mrf.mxu1  ;;  %1331 = vadd.xlane.f32.xlu1 %v1330_v59 }
 0x305   :  { %v3700_v49 = vadd.f32 %v3692_v37, %v1194_v26 }
 0x306   :  { %v2523_v51 = vpop.f32.mrf.mxu1 }
 0x307   :  { %v1333_v18 = vsel %vm122_vm1, %v3700_v49, 0.0 }
 0x308   :  { %v1197_v61 = vpop.f32.mrf.mxu1  ;;  %1334 = vadd.xlane.f32.xlu1 %v1333_v18 }
 0x309   :  { %v3705_v0 = vadd.f32 %v3692_v37, %v1197_v61 }
 0x30a   :  { %v2524_v60 = vpop.f32.mrf.mxu1 }
 0x30b   :  { %v1336_v11 = vsel %vm122_vm1, %v3705_v0, 0.0 }
 0x30c   :  { %v3712_v52 = vpop.f32.mrf.mxu1  ;;  %1337 = vadd.xlane.f32.xlu1 %v1336_v11 }
 0x30e   :  { %v2527_v6 = vpop.f32.mrf.mxu1 }
 0x310   :  { %v3719_v42 = vpop.f32.mrf.mxu1  ;;  %1328 = vadd.xlane.f32.xlu1 %v1327_v54 }
 0x312   :  { %v2528_v39 = vpop.f32.mrf.mxu1 }
 0x314   :  { %v3726_v17 = vpop.f32.mrf.mxu1  ;;  %1325 = vadd.xlane.f32.xlu1 %v1324_v15  ;;  %v707_v50 = vpop.xlane.xlu0 %706 }
 0x315   :  { %v747_v53 = vmul.f32 0.015625, %v707_v50 }
 0x316   :  { %v2531_v28 = vpop.f32.mrf.mxu1 }
 0x317   :  { %v785_v48 = vadd.f32 1e-05, %v747_v53 }
 0x318   :  { %v1213_v1 = vpop.f32.mrf.mxu1  ;;  %1322 = vadd.xlane.f32.xlu1 %v1321_v12  ;;  %v710_v13 = vpop.xlane.xlu1 %709 }
 0x319   :  { %2668 = vrsqrt.f32 %v785_v48  ;;  %v748_v29 = vmul.f32 0.015625, %v710_v13  ;;  %v3770_v10 = vadd.f32 %v3692_v37, %v1213_v1 }
 0x31a   :  { %v2532_v30 = vpop.f32.mrf.mxu1 }
 0x31b   :  { %v786_v55 = vadd.f32 1e-05, %v748_v29  ;;  %v1348_v46 = vsel %vm122_vm1, %v3770_v10, 0.0 }
 0x31c   :  { %1319 = vadd.xlane.f32.xlu1 %v1318_v36 }
 0x31d   :  { %2670 = vrsqrt.f32 %v786_v55 }
 0x320   :  { %1316 = vadd.xlane.f32.xlu1 %v1315_v21 }
 0x324   :  { %1313 = vadd.xlane.f32.xlu1 %v1312_v58 }
 0x326   :  { %v2669_v32 = vpop.eup %2668 }
 0x327   :  { %v861_v5 = vmul.f32 %v2669_v32, %v3592_v24  ;;  %v2749_v24 = vld [vmem:[%s4330_s4] ss:$0 sm:$0xff] }
 0x328   :  { %1310 = vadd.xlane.f32.xlu1 %v1309_v33 }
 0x329   :  { %v905_v23 = vmul.f32 %v2748_v8, %v861_v5 }
 0x32a   :  { %v2671_v38 = vpop.eup %2670 }
 0x32b   :  { %v862_v47 = vmul.f32 %v2671_v38, %v3597_v35  ;;  %v949_v45 = vadd.f32 %v2749_v24, %v905_v23  ;;  %v3776_v35 = vadd.f32 %v3692_v37, %v3662_v44 }
 0x32c   :  { %1307 = vadd.xlane.f32.xlu1 %v1306_v14 }
 0x32d   :  { %v906_v19 = vmul.f32 %v2748_v8, %v862_v47  ;;  %v987_v7 = vmax.f32 %v949_v45, 0.0  ;;  %v1297_v59 = vsel %vm122_vm1, %v3776_v35, 0.0 }
 0x32f   :  { %v950_v22 = vadd.f32 %v2749_v24, %v906_v19 }
 0x330   :  { %1304 = vadd.xlane.f32.xlu1 %v1303_v16 }
 0x331   :  { %v988_v9 = vmax.f32 %v950_v22, 0.0 }
 0x333   :  { %v1007_v56 = vpack.c.bf16 %v988_v9, %v987_v7 }
 0x334   :  { %1349 = vadd.xlane.f32.xlu1 %v1348_v46 }
 0x335   :  { %2566 = vmatmul.mubr.msk.bf16.gmra.mxu1 %vm367_vm2, %v1007_v56 }
 0x336   :  { %2581 = vmatprep.mubr.msk.f32.mxu1 %vm2773_vm0, %v2772_v2 }
 0x338   :  { %1298 = vadd.xlane.f32.xlu1 %v1297_v59 }
 0x360   :  { %v3785_v26 = vpop.f32.mrf.mxu1 }
 0x362   :  { %v2535_v51 = vpop.f32.mrf.mxu1 }
 0x364   :  { %v1221_v18 = vpop.f32.mrf.mxu1 }
 0x366   :  { %v2536_v44 = vpop.f32.mrf.mxu1 }
 0x368   :  { %v1226_v61 = vpop.f32.mrf.mxu1 }
 0x36a   :  { %v2539_v60 = vpop.f32.mrf.mxu1 }
 0x36c   :  { %v1229_v11 = vpop.f32.mrf.mxu1 }
 0x36d   :  { %v3826_v59 = vadd.f32 %v3692_v37, %v1229_v11 }
 0x36e   :  { %v2540_v6 = vpop.f32.mrf.mxu1 }
 0x36f   :  { %v3833_v6 = vadd.f32 %v3692_v37, %v1226_v61 }
 0x370   :  { %v1234_v54 = vpop.f32.mrf.mxu1 }
 0x371   :  { %v3821_v7 = vadd.f32 %v3692_v37, %v1234_v54  ;;  %v1360_v54 = vsel %vm122_vm1, %v3826_v59, 0.0  ;;  %v1357_v11 = vsel %vm122_vm1, %v3833_v6, 0.0 }
 0x372   :  { %v2543_v39 = vpop.f32.mrf.mxu1 }
 0x373   :  { %v1363_v51 = vsel %vm122_vm1, %v3821_v7, 0.0 }
 0x374   :  { %v1237_v15 = vpop.f32.mrf.mxu1 }
 0x375   :  { %v3816_v16 = vadd.f32 %v3692_v37, %v1237_v15 }
 0x376   :  { %v2544_v50 = vpop.f32.mrf.mxu1 }
 0x377   :  { %v1366_v9 = vsel %vm122_vm1, %v3816_v16, 0.0  ;;  %v3838_v50 = vadd.f32 %v3692_v37, %v1221_v18 }
 0x378   :  { %v1242_v53 = vpop.f32.mrf.mxu1 }
 0x379   :  { %v3811_v24 = vadd.f32 %v3692_v37, %v1242_v53  ;;  %v1354_v61 = vsel %vm122_vm1, %v3838_v50, 0.0 }
 0x37a   :  { %v2547_v28 = vpop.f32.mrf.mxu1 }
 0x37b   :  { %v1369_v22 = vsel %vm122_vm1, %v3811_v24, 0.0 }
 0x37c   :  { %v1245_v48 = vpop.f32.mrf.mxu1 }
 0x37d   :  { %v3806_v47 = vadd.f32 %v3692_v37, %v1245_v48  ;;  %v3844_v48 = vadd.f32 %v3692_v37, %v3785_v26 }
 0x37e   :  { %v2548_v12 = vpop.f32.mrf.mxu1 }
 0x37f   :  { %v1372_v45 = vsel %vm122_vm1, %v3806_v47, 0.0  ;;  %v3850_v12 = vadd.f32 %v3692_v37, %v3666_v25  ;;  %v1351_v18 = vsel %vm122_vm1, %v3844_v48, 0.0 }
 0x380   :  { %v1250_v1 = vpop.f32.mrf.mxu1 }
 0x381   :  { %v3801_v38 = vadd.f32 %v3692_v37, %v1250_v1  ;;  %v3856_v1 = vadd.f32 %v3692_v37, %v3726_v17  ;;  %v1300_v26 = vsel %vm122_vm1, %v3850_v12, 0.0  ;;  %v3867_v17 = vadd.f32 %v3692_v37, %v3719_v42 }
 0x382   :  { %v2551_v13 = vpop.f32.mrf.mxu1 }
 0x383   :  { %v1375_v19 = vsel %vm122_vm1, %v3801_v38, 0.0  ;;  %v1345_v13 = vsel %vm122_vm1, %v3856_v1, 0.0  ;;  %v1342_v42 = vsel %vm122_vm1, %v3867_v17, 0.0 }
 0x384   :  { %v1253_v29 = vpop.f32.mrf.mxu1 }
 0x385   :  { %v3788_v30 = vadd.f32 %v3692_v37, %v1253_v29 }
 0x386   :  { %v2552_v55 = vpop.f32.mrf.mxu1 }
 0x387   :  { %v1378_v36 = vsel %vm122_vm1, %v3788_v30, 0.0 }
 0x388   :  { %1379 = vadd.xlane.f32.xlu0 %v1378_v36  ;;  %v1258_v21 = vpop.f32.mrf.mxu1 }
 0x389   :  { %v3793_v58 = vadd.f32 %v3692_v37, %v1258_v21 }
 0x38a   :  { %v2555_v32 = vpop.f32.mrf.mxu1 }
 0x38b   :  { %v1381_v33 = vsel %vm122_vm1, %v3793_v58, 0.0 }
 0x38c   :  { %1382 = vadd.xlane.f32.xlu0 %v1381_v33  ;;  %v1261_v5 = vpop.f32.mrf.mxu1 }
 0x38d   :  { %v3798_v8 = vadd.f32 %v3692_v37, %v1261_v5  ;;  %v1332_v29 = vpop.xlane.xlu1 %1331 }
 0x38e   :  { %v2556_v23 = vpop.f32.mrf.mxu1 }
 0x38f   :  { %v1384_v14 = vsel %vm122_vm1, %v3798_v8, 0.0 }
 0x390   :  { %1385 = vadd.xlane.f32.xlu0 %v1384_v14 }
 0x391   :  { %v1335_v55 = vpop.xlane.xlu1 %1334 }
 0x394   :  { %1376 = vadd.xlane.f32.xlu0 %v1375_v19 }
 0x395   :  { %v1338_v25 = vpop.xlane.xlu1 %1337 }
 0x398   :  { %1373 = vadd.xlane.f32.xlu0 %v1372_v45 }
 0x399   :  { %v1329_v36 = vpop.xlane.xlu1 %1328 }
 0x39c   :  { %1370 = vadd.xlane.f32.xlu0 %v1369_v22 }
 0x39d   :  { %v1326_v19 = vpop.xlane.xlu1 %1325 }
 0x3a0   :  { %1367 = vadd.xlane.f32.xlu0 %v1366_v9  ;;  %v1266_v46 = vpop.f32.mrf.mxu1 }
 0x3a2   :  { %v2559_v56 = vpop.f32.mrf.mxu1 }
 0x3a4   :  { %1364 = vadd.xlane.f32.xlu0 %v1363_v51  ;;  %v3830_v44 = vpop.f32.mrf.mxu1  ;;  %v1419_v51 = vmul.f32 0.03125, %v1332_v29 }
 0x3a5   :  { %v3919_v29 = vadd.f32 %v3692_v37, %v3830_v44  ;;  %v1417_v44 = vmul.f32 0.03125, %v1326_v19 }
 0x3a6   :  { %v2560_v60 = vpop.f32.mrf.mxu1 }
 0x3a7   :  { %v3886_v60 = vadd.f32 %v3692_v37, %v3657_v27  ;;  %v3901_v27 = vsub.f32 %v3695_v41, %v1419_v51 }
 0x3a8   :  { %1361 = vadd.xlane.f32.xlu0 %v1360_v54  ;;  %v1274_v39 = vpop.f32.mrf.mxu1  ;;  %v3890_v54 = vadd.f32 %v3692_v37, %v3659_v3  ;;  %v3904_v3 = vadd.f32 %v3692_v37, %v1266_v46  ;;  %v1421_v46 = vmul.f32 0.03125, %v1338_v25 }
 0x3a9   :  { %v3875_v22 = vadd.f32 %v3692_v37, %v1274_v39  ;;  %v1495_v41 = vmul.f32 %v3901_v27, %v3901_v27 }
 0x3aa   :  { %v2563_v15 = vpop.f32.mrf.mxu1 }
 0x3ab   :  { %v1393_v39 = vsel %vm122_vm1, %v3875_v22, 0.0 }
 0x3ac   :  { %1358 = vadd.xlane.f32.xlu0 %v1357_v11  ;;  %v1277_v53 = vpop.f32.mrf.mxu1  ;;  %v1323_v11 = vpop.xlane.xlu1 %1322 }
 0x3ad   :  { %v3878_v9 = vadd.f32 %v3692_v37, %v1277_v53  ;;  %v3898_v53 = vadd.f32 %v3692_v37, %v3712_v52 }
 0x3ae   :  { %v2564_v28 = vpop.f32.mrf.mxu1 }
 0x3af   :  { %v1396_v15 = vsel %vm122_vm1, %v3878_v9, 0.0  ;;  %v1420_v28 = vmul.f32 0.03125, %v1335_v55  ;;  %v1339_v52 = vsel %vm122_vm1, %v3898_v53, 0.0  ;;  %v1387_v55 = vsel %vm122_vm1, %v3904_v3, 0.0 }
 0x3b0   :  { %1355 = vadd.xlane.f32.xlu0 %v1354_v61  ;;  %v1291_v61 = vsel %vm122_vm1, %v3886_v60, 0.0 }
 0x3b4   :  { %1352 = vadd.xlane.f32.xlu0 %v1351_v18  ;;  %v1294_v18 = vsel %vm122_vm1, %v3890_v54, 0.0 }
 0x3b8   :  { %1301 = vadd.xlane.f32.xlu0 %v1300_v26  ;;  %v1320_v26 = vpop.xlane.xlu1 %1319 }
 0x3bc   :  { %1346 = vadd.xlane.f32.xlu0 %v1345_v13  ;;  %v3915_v13 = vsub.f32 %v3700_v49, %v1420_v28  ;;  %v1559_v49 = vsel %vm122_vm1, %v1495_v41, 0.0 }
 0x3be   :  { %v1496_v25 = vmul.f32 %v3915_v13, %v3915_v13 }
 0x3f5   :  { %v1282_v21 = vpop.f32.mrf.mxu1 }
 0x3f6   :  { %v3863_v32 = vadd.f32 %v3692_v37, %v1282_v21  ;;  %v1418_v21 = vmul.f32 0.03125, %v1329_v36  ;;  %v1562_v36 = vsel %vm122_vm1, %v1496_v25, 0.0 }
 0x3f7   :  { %v2567_v33 = vpop.f32.mrf.mxu1 }
 0x3f8   :  { %v1399_v5 = vsel %vm122_vm1, %v3863_v32, 0.0  ;;  %v3924_v33 = vsub.f32 %v3705_v0, %v1421_v46 }
 0x3f9   :  { %1400 = vadd.xlane.f32.xlu1 %v1399_v5  ;;  %v1285_v23 = vpop.f32.mrf.mxu1  ;;  %v1390_v5 = vsel %vm122_vm1, %v3919_v29, 0.0 }
 0x3fa   :  { %v3872_v14 = vadd.f32 %v3692_v37, %v1285_v23  ;;  %v1317_v23 = vpop.xlane.xlu1 %1316  ;;  %v3932_v37 = vsub.f32 %v3708_v63, %v1418_v21  ;;  %v1497_v0 = vmul.f32 %v3924_v33, %v3924_v33 }
 0x3fb   :  { %v2568_v45 = vpop.f32.mrf.mxu1 }
 0x3fc   :  { %v1402_v56 = vsel %vm122_vm1, %v3872_v14, 0.0  ;;  %v1494_v51 = vmul.f32 %v3932_v37, %v3932_v37  ;;  %v1565_v19 = vsel %vm122_vm1, %v1497_v0, 0.0 }
 0x3fd   :  { %1343 = vadd.xlane.f32.xlu1 %v1342_v42  ;;  %1403 = vadd.xlane.f32.xlu0 %v1402_v56 }
 0x3fe   :  { %v1314_v56 = vpop.xlane.xlu1 %1313  ;;  %v1556_v41 = vsel %vm122_vm1, %v1494_v51, 0.0 }
 0x3ff   :  { %v1413_v51 = vmul.f32 0.03125, %v1314_v56 }
 0x401   :  { %1394 = vadd.xlane.f32.xlu1 %v1393_v39  ;;  %1397 = vadd.xlane.f32.xlu0 %v1396_v15  ;;  %v3940_v39 = vsub.f32 %v3715_v62, %v1417_v44  ;;  %v1416_v15 = vmul.f32 0.03125, %v1323_v11  ;;  %v3988_v56 = vsub.f32 %v3739_v4, %v1413_v51 }
 0x403   :  { %v3950_v46 = vsub.f32 %v3722_v40, %v1416_v15  ;;  %v1493_v11 = vmul.f32 %v3940_v39, %v3940_v39  ;;  %v1414_v40 = vmul.f32 0.03125, %v1317_v23 }
 0x405   :  { %1292 = vadd.xlane.f32.xlu1 %v1291_v61  ;;  %1295 = vadd.xlane.f32.xlu0 %v1294_v18  ;;  %v1553_v44 = vsel %vm122_vm1, %v1493_v11, 0.0 }
 0x409   :  { %1388 = vadd.xlane.f32.xlu1 %v1387_v55  ;;  %1340 = vadd.xlane.f32.xlu0 %v1339_v52  ;;  %v1415_v52 = vmul.f32 0.03125, %v1320_v26  ;;  %v1311_v55 = vpop.xlane.xlu1 %1310 }
 0x40d   :  { %1391 = vadd.xlane.f32.xlu0 %v1390_v5  ;;  %1560 = vadd.xlane.f32.xlu1 %v1559_v49  ;;  %v3961_v49 = vsub.f32 %v3729_v57, %v1415_v52  ;;  %v3973_v57 = vsub.f32 %v3734_v43, %v1414_v40  ;;  %v1308_v23 = vpop.xlane.xlu1 %1307 }
 0x411   :  { %v1380_v45 = vpop.xlane.xlu0 %1379  ;;  %1563 = vadd.xlane.f32.xlu1 %v1562_v36  ;;  %v1492_v36 = vmul.f32 %v3950_v46, %v3950_v46 }
 0x412   :  { %v1435_v42 = vmul.f32 0.03125, %v1380_v45 }
 0x414   :  { %v3943_v63 = vsub.f32 %v3788_v30, %v1435_v42 }
 0x415   :  { %v1383_v28 = vpop.xlane.xlu0 %1382  ;;  %1566 = vadd.xlane.f32.xlu1 %v1565_v19 }
 0x416   :  { %v1436_v61 = vmul.f32 0.03125, %v1383_v28  ;;  %v1511_v18 = vmul.f32 %v3943_v63, %v3943_v63  ;;  %v1550_v28 = vsel %vm122_vm1, %v1492_v36, 0.0  ;;  %v1489_v36 = vmul.f32 %v3988_v56, %v3988_v56 }
 0x418   :  { %v3953_v62 = vsub.f32 %v3793_v58, %v1436_v61  ;;  %v1607_v30 = vsel %vm122_vm1, %v1511_v18, 0.0 }
 0x419   :  { %v1386_v21 = vpop.xlane.xlu0 %1385  ;;  %1608 = vadd.xlane.f32.xlu0 %v1607_v30  ;;  %1557 = vadd.xlane.f32.xlu1 %v1556_v41  ;;  %v1490_v41 = vmul.f32 %v3973_v57, %v3973_v57 }
 0x41a   :  { %v1437_v5 = vmul.f32 0.03125, %v1386_v21  ;;  %v1512_v26 = vmul.f32 %v3953_v62, %v3953_v62  ;;  %v1305_v21 = vpop.xlane.xlu1 %1304 }
 0x41c   :  { %v3964_v58 = vsub.f32 %v3798_v8, %v1437_v5  ;;  %v1610_v25 = vsel %vm122_vm1, %v1512_v26, 0.0  ;;  %v1491_v8 = vmul.f32 %v3961_v49, %v3961_v49 }
 0x41d   :  { %v1377_v0 = vpop.xlane.xlu0 %1376  ;;  %1611 = vadd.xlane.f32.xlu0 %v1610_v25  ;;  %1554 = vadd.xlane.f32.xlu1 %v1553_v44  ;;  %v1411_v25 = vmul.f32 0.03125, %v1308_v23  ;;  %v1544_v44 = vsel %vm122_vm1, %v1490_v41, 0.0 }
 0x41e   :  { %v1434_v45 = vmul.f32 0.03125, %v1377_v0  ;;  %v1513_v42 = vmul.f32 %v3964_v58, %v3964_v58  ;;  %v1547_v52 = vsel %vm122_vm1, %v1491_v8, 0.0  ;;  %v1350_v8 = vpop.xlane.xlu1 %1349 }
 0x41f   :  { %v4009_v23 = vsub.f32 %v3751_v20, %v1411_v25 }
 0x420   :  { %v3978_v15 = vsub.f32 %v3801_v38, %v1434_v45  ;;  %v1613_v19 = vsel %vm122_vm1, %v1513_v42, 0.0  ;;  %v1412_v38 = vmul.f32 0.03125, %v1311_v55 }
 0x421   :  { %v1374_v61 = vpop.xlane.xlu0 %1373  ;;  %1614 = vadd.xlane.f32.xlu0 %v1613_v19  ;;  %1551 = vadd.xlane.f32.xlu1 %v1550_v28  ;;  %v1541_v19 = vsel %vm122_vm1, %v1489_v36, 0.0 }
 0x422   :  { %v1433_v18 = vmul.f32 0.03125, %v1374_v61  ;;  %v1510_v43 = vmul.f32 %v3978_v15, %v3978_v15  ;;  %v3998_v4 = vsub.f32 %v3745_v34, %v1412_v38  ;;  %v1410_v34 = vmul.f32 0.03125, %v1305_v21  ;;  %v1299_v21 = vpop.xlane.xlu1 %1298 }
 0x424   :  { %v3991_v30 = vsub.f32 %v3806_v47, %v1433_v18  ;;  %v1604_v11 = vsel %vm122_vm1, %v1510_v43, 0.0  ;;  %v1488_v28 = vmul.f32 %v3998_v4, %v3998_v4  ;;  %v4021_v43 = vsub.f32 %v3761_v31, %v1410_v34 }
 0x425   :  { %v1371_v5 = vpop.xlane.xlu0 %1370  ;;  %1605 = vadd.xlane.f32.xlu0 %v1604_v11  ;;  %1548 = vadd.xlane.f32.xlu1 %v1547_v52  ;;  %v1425_v52 = vmul.f32 0.03125, %v1350_v8 }
 0x426   :  { %v1432_v26 = vmul.f32 0.03125, %v1371_v5  ;;  %v1509_v40 = vmul.f32 %v3991_v30, %v3991_v30  ;;  %v1538_v11 = vsel %vm122_vm1, %v1488_v28, 0.0  ;;  %v1486_v25 = vmul.f32 %v4021_v43, %v4021_v43 }
 0x428   :  { %v4001_v55 = vsub.f32 %v3811_v24, %v1432_v26  ;;  %v1601_v47 = vsel %vm122_vm1, %v1509_v40, 0.0  ;;  %v1532_v34 = vsel %vm122_vm1, %v1486_v25, 0.0 }
 0x429   :  { %v1368_v0 = vpop.xlane.xlu0 %1367  ;;  %1602 = vadd.xlane.f32.xlu0 %v1601_v47  ;;  %1545 = vadd.xlane.f32.xlu1 %v1544_v44  ;;  %v1408_v44 = vmul.f32 0.03125, %v1299_v21 }
 0x42a   :  { %v1431_v45 = vmul.f32 0.03125, %v1368_v0  ;;  %v1508_v42 = vmul.f32 %v4001_v55, %v4001_v55 }
 0x42b   :  { %v4046_v8 = vsub.f32 %v3776_v35, %v1408_v44 }
 0x42c   :  { %v4012_v24 = vsub.f32 %v3816_v16, %v1431_v45  ;;  %v1598_v51 = vsel %vm122_vm1, %v1508_v42, 0.0  ;;  %v1487_v16 = vmul.f32 %v4009_v23, %v4009_v23 }
 0x42d   :  { %v1365_v61 = vpop.xlane.xlu0 %1364  ;;  %1599 = vadd.xlane.f32.xlu0 %v1598_v51  ;;  %1542 = vadd.xlane.f32.xlu1 %v1541_v19 }
 0x42e   :  { %v1430_v18 = vmul.f32 0.03125, %v1365_v61  ;;  %v1507_v20 = vmul.f32 %v4012_v24, %v4012_v24  ;;  %v1535_v40 = vsel %vm122_vm1, %v1487_v16, 0.0 }
 0x430   :  { %v4026_v41 = vsub.f32 %v3821_v7, %v1430_v18  ;;  %v1595_v38 = vsel %vm122_vm1, %v1507_v20, 0.0  ;;  %v4036_v7 = vsub.f32 %v3770_v10, %v1425_v52  ;;  %v1484_v20 = vmul.f32 %v4046_v8, %v4046_v8 }
 0x431   :  { %v1362_v5 = vpop.xlane.xlu0 %1361  ;;  %1596 = vadd.xlane.f32.xlu0 %v1595_v38  ;;  %1539 = vadd.xlane.f32.xlu1 %v1538_v11 }
 0x432   :  { %v1429_v26 = vmul.f32 0.03125, %v1362_v5  ;;  %v1506_v31 = vmul.f32 %v4026_v41, %v4026_v41  ;;  %v1501_v51 = vmul.f32 %v4036_v7, %v4036_v7  ;;  %v1526_v21 = vsel %vm122_vm1, %v1484_v20, 0.0 }
 0x434   :  { %v4039_v47 = vsub.f32 %v3826_v59, %v1429_v26  ;;  %v1592_v36 = vsel %vm122_vm1, %v1506_v31, 0.0 }
 0x435   :  { %v1359_v0 = vpop.xlane.xlu0 %1358  ;;  %1593 = vadd.xlane.f32.xlu0 %v1592_v36  ;;  %1536 = vadd.xlane.f32.xlu1 %v1535_v40 }
 0x436   :  { %v1428_v45 = vmul.f32 0.03125, %v1359_v0  ;;  %v1505_v42 = vmul.f32 %v4039_v47, %v4039_v47 }
 0x438   :  { %v4049_v10 = vsub.f32 %v3833_v6, %v1428_v45  ;;  %v1589_v59 = vsel %vm122_vm1, %v1505_v42, 0.0  ;;  %v1577_v6 = vsel %vm122_vm1, %v1501_v51, 0.0 }
 0x439   :  { %v1356_v19 = vpop.xlane.xlu0 %1355  ;;  %1590 = vadd.xlane.f32.xlu0 %v1589_v59  ;;  %1533 = vadd.xlane.f32.xlu1 %v1532_v34 }
 0x43a   :  { %v1427_v28 = vmul.f32 0.03125, %v1356_v19  ;;  %v1504_v61 = vmul.f32 %v4049_v10, %v4049_v10 }
 0x43c   :  { %v4057_v18 = vsub.f32 %v3838_v50, %v1427_v28  ;;  %v1586_v35 = vsel %vm122_vm1, %v1504_v61, 0.0 }
 0x43d   :  { %v1353_v16 = vpop.xlane.xlu0 %1352  ;;  %1587 = vadd.xlane.f32.xlu0 %v1586_v35  ;;  %1578 = vadd.xlane.f32.xlu1 %v1577_v6 }
 0x43e   :  { %v1426_v52 = vmul.f32 0.03125, %v1353_v16  ;;  %v1503_v38 = vmul.f32 %v4057_v18, %v4057_v18 }
 0x440   :  { %v4066_v11 = vsub.f32 %v3844_v48, %v1426_v52  ;;  %v1583_v50 = vsel %vm122_vm1, %v1503_v38, 0.0 }
 0x441   :  { %v1302_v5 = vpop.xlane.xlu0 %1301  ;;  %1584 = vadd.xlane.f32.xlu0 %v1583_v50  ;;  %1527 = vadd.xlane.f32.xlu1 %v1526_v21 }
 0x442   :  { %v1409_v26 = vmul.f32 0.03125, %v1302_v5  ;;  %v1502_v31 = vmul.f32 %v4066_v11, %v4066_v11 }
 0x444   :  { %v4073_v40 = vsub.f32 %v3850_v12, %v1409_v26  ;;  %v1580_v25 = vsel %vm122_vm1, %v1502_v31, 0.0 }
 0x445   :  { %v1347_v44 = vpop.xlane.xlu0 %1346  ;;  %1581 = vadd.xlane.f32.xlu0 %v1580_v25 }
 0x446   :  { %v1424_v48 = vmul.f32 0.03125, %v1347_v44  ;;  %v1485_v36 = vmul.f32 %v4073_v40, %v4073_v40 }
 0x448   :  { %v4079_v0 = vsub.f32 %v3856_v1, %v1424_v48  ;;  %v1529_v45 = vsel %vm122_vm1, %v1485_v36, 0.0 }
 0x449   :  { %1530 = vadd.xlane.f32.xlu0 %v1529_v45 }
 0x44a   :  { %v1500_v42 = vmul.f32 %v4079_v0, %v4079_v0 }
 0x44c   :  { %v1574_v12 = vsel %vm122_vm1, %v1500_v42, 0.0 }
 0x44d   :  { %1575 = vadd.xlane.f32.xlu0 %v1574_v12 }
 0x482   :  { %v1401_v34 = vpop.xlane.xlu1 %1400 }
 0x483   :  { %v1442_v59 = vmul.f32 0.03125, %v1401_v34 }
 0x485   :  { %v4086_v51 = vsub.f32 %v3863_v32, %v1442_v59 }
 0x486   :  { %v1404_v19 = vpop.xlane.xlu0 %1403  ;;  %v1344_v28 = vpop.xlane.xlu1 %1343 }
 0x487   :  { %v1443_v61 = vmul.f32 0.03125, %v1404_v19  ;;  %v1423_v35 = vmul.f32 0.03125, %v1344_v28  ;;  %v1518_v1 = vmul.f32 %v4086_v51, %v4086_v51 }
 0x489   :  { %v4091_v6 = vsub.f32 %v3872_v14, %v1443_v61  ;;  %v4094_v20 = vsub.f32 %v3867_v17, %v1423_v35  ;;  %v1628_v16 = vsel %vm122_vm1, %v1518_v1, 0.0 }
 0x48a   :  { %v1398_v52 = vpop.xlane.xlu0 %1397  ;;  %1629 = vadd.xlane.f32.xlu1 %v1628_v16  ;;  %v1395_v38 = vpop.xlane.xlu1 %1394 }
 0x48b   :  { %v1441_v32 = vmul.f32 0.03125, %v1398_v52  ;;  %v1440_v50 = vmul.f32 0.03125, %v1395_v38  ;;  %v1519_v21 = vmul.f32 %v4091_v6, %v4091_v6  ;;  %v1499_v5 = vmul.f32 %v4094_v20, %v4094_v20 }
 0x48d   :  { %v4102_v26 = vsub.f32 %v3878_v9, %v1441_v32  ;;  %v4105_v14 = vsub.f32 %v3875_v22, %v1440_v50  ;;  %v1631_v17 = vsel %vm122_vm1, %v1519_v21, 0.0  ;;  %v1571_v31 = vsel %vm122_vm1, %v1499_v5, 0.0 }
 0x48e   :  { %1632 = vadd.xlane.f32.xlu0 %v1631_v17  ;;  %v1296_v25 = vpop.xlane.xlu0 %1295  ;;  %1572 = vadd.xlane.f32.xlu1 %v1571_v31  ;;  %v1293_v44 = vpop.xlane.xlu1 %1292 }
 0x48f   :  { %v1407_v48 = vmul.f32 0.03125, %v1296_v25  ;;  %v1406_v36 = vmul.f32 0.03125, %v1293_v44  ;;  %v1517_v45 = vmul.f32 %v4102_v26, %v4102_v26  ;;  %v1516_v9 = vmul.f32 %v4105_v14, %v4105_v14 }
 0x491   :  { %v4114_v42 = vsub.f32 %v3890_v54, %v1407_v48  ;;  %v4117_v22 = vsub.f32 %v3886_v60, %v1406_v36  ;;  %v1625_v12 = vsel %vm122_vm1, %v1517_v45, 0.0  ;;  %v1622_v34 = vsel %vm122_vm1, %v1516_v9, 0.0 }
 0x492   :  { %1626 = vadd.xlane.f32.xlu0 %v1625_v12  ;;  %v1341_v59 = vpop.xlane.xlu0 %1340  ;;  %1623 = vadd.xlane.f32.xlu1 %v1622_v34  ;;  %v1389_v19 = vpop.xlane.xlu1 %1388 }
 0x493   :  { %v1422_v28 = vmul.f32 0.03125, %v1341_v59  ;;  %v1438_v61 = vmul.f32 0.03125, %v1389_v19  ;;  %v1483_v35 = vmul.f32 %v4114_v42, %v4114_v42  ;;  %v1482_v54 = vmul.f32 %v4117_v22, %v4117_v22 }
 0x495   :  { %v4126_v1 = vsub.f32 %v3898_v53, %v1422_v28  ;;  %v4129_v60 = vsub.f32 %v3904_v3, %v1438_v61  ;;  %v1523_v16 = vsel %vm122_vm1, %v1483_v35, 0.0  ;;  %v1520_v52 = vsel %vm122_vm1, %v1482_v54, 0.0 }
 0x496   :  { %1524 = vadd.xlane.f32.xlu0 %v1523_v16  ;;  %v1392_v38 = vpop.xlane.xlu0 %1391  ;;  %1521 = vadd.xlane.f32.xlu1 %v1520_v52  ;;  %v1561_v32 = vpop.xlane.xlu1 %1560 }
 0x497   :  { %v1439_v50 = vmul.f32 0.03125, %v1392_v38  ;;  %v1498_v21 = vmul.f32 %v4126_v1, %v4126_v1  ;;  %v1514_v5 = vmul.f32 %v4129_v60, %v4129_v60  ;;  %v1647_v59 = vmul.f32 0.03125, %v1561_v32 }
 0x499   :  { %v4138_v53 = vsub.f32 %v3919_v29, %v1439_v50  ;;  %v1568_v3 = vsel %vm122_vm1, %v1498_v21, 0.0  ;;  %v1616_v17 = vsel %vm122_vm1, %v1514_v5, 0.0  ;;  %v1685_v52 = vadd.f32 1e-05, %v1647_v59 }
 0x49a   :  { %1569 = vadd.xlane.f32.xlu0 %v1568_v3  ;;  %1617 = vadd.xlane.f32.xlu1 %v1616_v17  ;;  %v1564_v31 = vpop.xlane.xlu1 %1563 }
 0x49b   :  { %v1515_v25 = vmul.f32 %v4138_v53, %v4138_v53  ;;  %v1648_v45 = vmul.f32 0.03125, %v1564_v31 }
 0x49d   :  { %v1619_v44 = vsel %vm122_vm1, %v1515_v25, 0.0  ;;  %v1686_v19 = vadd.f32 1e-05, %v1648_v45 }
 0x49e   :  { %1620 = vadd.xlane.f32.xlu0 %v1619_v44  ;;  %v1567_v48 = vpop.xlane.xlu1 %1566 }
 0x49f   :  { %v1649_v36 = vmul.f32 0.03125, %v1567_v48 }
 0x4a1   :  { %v1687_v29 = vadd.f32 1e-05, %v1649_v36 }
 0x4a2   :  { %v1609_v9 = vpop.xlane.xlu0 %1608  ;;  %v1558_v12 = vpop.xlane.xlu1 %1557 }
 0x4a3   :  { %v1663_v34 = vmul.f32 0.03125, %v1609_v9  ;;  %2672 = vrsqrt.f32 %v1687_v29  ;;  %v1646_v38 = vmul.f32 0.03125, %v1558_v12 }
 0x4a4   :  { %2674 = vrsqrt.f32 %v1686_v19 }
 0x4a5   :  { %v1701_v54 = vadd.f32 1e-05, %v1663_v34  ;;  %v1684_v17 = vadd.f32 1e-05, %v1646_v38 }
 0x4a6   :  { %v1612_v28 = vpop.xlane.xlu0 %1611  ;;  %v1555_v61 = vpop.xlane.xlu1 %1554 }
 0x4a7   :  { %v1664_v35 = vmul.f32 0.03125, %v1612_v28  ;;  %v1645_v31 = vmul.f32 0.03125, %v1555_v61 }
 0x4a9   :  { %v1702_v16 = vadd.f32 1e-05, %v1664_v35  ;;  %v1683_v36 = vadd.f32 1e-05, %v1645_v31 }
 0x4aa   :  { %v1615_v50 = vpop.xlane.xlu0 %1614  ;;  %v1552_v21 = vpop.xlane.xlu1 %1551 }
 0x4ab   :  { %2676 = vrsqrt.f32 %v1702_v16  ;;  %v1665_v5 = vmul.f32 0.03125, %v1615_v50  ;;  %v1644_v45 = vmul.f32 0.03125, %v1552_v21 }
 0x4ac   :  { %2678 = vrsqrt.f32 %v1701_v54 }
 0x4ad   :  { %v1703_v3 = vadd.f32 1e-05, %v1665_v5  ;;  %2680 = vrsqrt.f32 %v1685_v52  ;;  %v1682_v19 = vadd.f32 1e-05, %v1644_v45 }
 0x4ae   :  { %v1606_v32 = vpop.xlane.xlu0 %1605  ;;  %v1549_v25 = vpop.xlane.xlu1 %1548 }
 0x4af   :  { %2682 = vrsqrt.f32 %v1703_v3  ;;  %v1662_v44 = vmul.f32 0.03125, %v1606_v32  ;;  %v1643_v28 = vmul.f32 0.03125, %v1549_v25 }
 0x4b0   :  { %2684 = vrsqrt.f32 %v1684_v17  ;;  %v2673_v34 = vpop.eup %2672 }
 0x4b1   :  { %v1700_v48 = vadd.f32 1e-05, %v1662_v44  ;;  %v2675_v61 = vpop.eup %2674  ;;  %v1763_v38 = vmul.f32 %v2673_v34, %v3924_v33  ;;  %v1681_v17 = vadd.f32 1e-05, %v1643_v28 }
 0x4b2   :  { %v1603_v9 = vpop.xlane.xlu0 %1602  ;;  %v1546_v29 = vpop.xlane.xlu1 %1545  ;;  %v1762_v3 = vmul.f32 %v2675_v61, %v3915_v13 }
 0x4b3   :  { %2686 = vrsqrt.f32 %v1700_v48  ;;  %v1661_v12 = vmul.f32 0.03125, %v1603_v9  ;;  %v1642_v31 = vmul.f32 0.03125, %v1546_v29 }
 0x4b4   :  { %2688 = vrsqrt.f32 %v1683_v36  ;;  %v4151_v36 = vld [vmem:[%s4333_s7] ss:$0 sm:$0xff] }
 0x4b5   :  { %v1699_v59 = vadd.f32 1e-05, %v1661_v12  ;;  %v1807_v45 = vmul.f32 %v4151_v36, %v1763_v38  ;;  %v1680_v34 = vadd.f32 1e-05, %v1642_v31  ;;  %v1806_v28 = vmul.f32 %v4151_v36, %v1762_v3 }
 0x4b6   :  { %v1600_v35 = vpop.xlane.xlu0 %1599  ;;  %v1543_v54 = vpop.xlane.xlu1 %1542 }
 0x4b7   :  { %2690 = vrsqrt.f32 %v1699_v59  ;;  %v1660_v16 = vmul.f32 0.03125, %v1600_v35 }
 0x4b8   :  { %v2677_v52 = vpop.eup %2676  ;;  %2692 = vrsqrt.f32 %v1682_v19 }
 0x4b9   :  { %v2679_v50 = vpop.eup %2678  ;;  %v1698_v5 = vadd.f32 1e-05, %v1660_v16  ;;  %v1778_v21 = vmul.f32 %v2677_v52, %v3953_v62  ;;  %v1641_v52 = vmul.f32 0.03125, %v1543_v54  ;;  %v4175_v54 = vld [vmem:[%s4335_s9] sm:$0xff]  ;;  %s2776_s9 = smov [#allocation3]  }
 0x4ba   :  { %v1597_v32 = vpop.xlane.xlu0 %1596  ;;  %v1540_v44 = vpop.xlane.xlu1 %1539  ;;  %v1777_v62 = vmul.f32 %v2679_v50, %v3943_v63  ;;  %v4162_v63 = vld [vmem:[%s4334_s8] ss:$0 sm:$0xff]  ;;  %2396 = vmatprep.mubr.msk.f32.mxu0 %vm122_vm1, %v4175_v54  ;;  %s2222_s12 = sshll.u32 %s2776_s9, 4  ;;  %s2223_s12 = int_to_ptr.vmem [resolvable:$true] %s2222_s12 }
 0x4bb   :  { %v2681_v25 = vpop.eup %2680  ;;  %2694 = vrsqrt.f32 %v1698_v5  ;;  %v1659_v48 = vmul.f32 0.03125, %v1597_v32  ;;  %v1822_v29 = vmul.f32 %v4151_v36, %v1778_v21  ;;  %v1850_v31 = vadd.f32 %v4162_v63, %v1806_v28  ;;  %s2750_s13 = scalar_lea.vmem %s2223_s12, 48  ;;  %s2754_s14 = scalar_lea.vmem %s2223_s12, 64 }
 0x4bc   :  { %v2683_v33 = vpop.eup %2682  ;;  %v1761_v12 = vmul.f32 %v2681_v25, %v3901_v27  ;;  %2696 = vrsqrt.f32 %v1681_v17  ;;  %v1851_v27 = vadd.f32 %v4162_v63, %v1807_v45  ;;  %v1821_v38 = vmul.f32 %v4151_v36, %v1777_v62  ;;  %p2751_p0 = scmp.ne.s32.totalorder %s2223_s12, %s2750_s13  ;;  %p2755_p1 = scmp.lt.s32.totalorder %s2223_s12, %s2223_s12 }
 0x4bd   :  { %v1697_v9 = vadd.f32 1e-05, %v1659_v48  ;;  %v1779_v13 = vmul.f32 %v2683_v33, %v3964_v58  ;;  %v2685_v35 = vpop.eup %2684  ;;  %v1866_v21 = vadd.f32 %v4162_v63, %v1822_v29  ;;  %p2756_p2 = scmp.lt.s32.totalorder %s2754_s14, %s2750_s13 }
 0x4be   :  { %v1594_v59 = vpop.xlane.xlu0 %1593  ;;  %v1537_v19 = vpop.xlane.xlu1 %1536  ;;  %v1805_v32 = vmul.f32 %v4151_v36, %v1761_v12  ;;  %v1760_v48 = vmul.f32 %v2685_v35, %v3932_v37  ;;  %v1889_v29 = vmax.f32 %v1851_v27, 0.0  ;;  %v1865_v28 = vadd.f32 %v4162_v63, %v1821_v38 }
 0x4bf   :  { %2698 = vrsqrt.f32 %v1697_v9  ;;  %v1658_v61 = vmul.f32 0.03125, %v1594_v59  ;;  %v1823_v58 = vmul.f32 %v4151_v36, %v1779_v13  ;;  %v1679_v9 = vadd.f32 1e-05, %v1641_v52  ;;  %p2757_p3 = por %p2756_p2, %p2755_p1 }
 0x4c0   :  { %v2687_v16 = vpop.eup %2686  ;;  %2700 = vrsqrt.f32 %v1680_v34  ;;  %v1640_v13 = vmul.f32 0.03125, %v1540_v44  ;;  %v1904_v59 = vmax.f32 %v1866_v21, 0.0  ;;  %v1804_v27 = vmul.f32 %v4151_v36, %v1760_v48 }
 0x4c1   :  { %v1696_v50 = vadd.f32 1e-05, %v1658_v61  ;;  %v1867_v5 = vadd.f32 %v4162_v63, %v1823_v58  ;;  %v1776_v3 = vmul.f32 %v2687_v16, %v3978_v15  ;;  %v2689_v25 = vpop.eup %2688  ;;  %v1888_v61 = vmax.f32 %v1850_v31, 0.0  ;;  %p2758_p4 = pnand %p2757_p3, %p2751_p0 }
 0x4c2   :  { %v1591_v17 = vpop.xlane.xlu0 %1590  ;;  %v1534_v45 = vpop.xlane.xlu1 %1533  ;;  %v1849_v58 = vadd.f32 %v4162_v63, %v1805_v32  ;;  %v1759_v44 = vmul.f32 %v2689_v25, %v3940_v39  ;;  %v1678_v38 = vadd.f32 1e-05, %v1640_v13  ;;  %v2171_v39 = vld [vmem:[#allocation2] sm:$0x1] }
 0x4c3   :  { %2702 = vrsqrt.f32 %v1696_v50  ;;  %v1657_v33 = vmul.f32 0.03125, %v1591_v17  ;;  %v1905_v62 = vmax.f32 %v1867_v5, 0.0  ;;  %v1820_v12 = vmul.f32 %v4151_v36, %v1776_v3 }
 0x4c4   :  { %v2691_v15 = vpop.eup %2690  ;;  %v1639_v5 = vmul.f32 0.03125, %v1537_v19  ;;  %v1903_v17 = vmax.f32 %v1865_v28, 0.0  ;;  %v1887_v48 = vmax.f32 %v1849_v58, 0.0  ;;  %v1803_v13 = vmul.f32 %v4151_v36, %v1759_v44 }
 0x4c5   :  { %v1695_v34 = vadd.f32 1e-05, %v1657_v33  ;;  %2364 = vmatprep.subr.msk.mxu0 %vm122_vm1, %v1905_v62  ;;  %v1775_v37 = vmul.f32 %v2691_v15, %v3991_v30  ;;  %v2693_v16 = vpop.eup %2692  ;;  %v1864_v30 = vadd.f32 %v4162_v63, %v1820_v12  ;;  %v1638_v33 = vmul.f32 0.03125, %v1534_v45 }
 0x4c6   :  { %v1588_v35 = vpop.xlane.xlu0 %1587  ;;  %2365 = vmatpush3.xpose.msk.msra.mxu0 %vm122_vm1, %v1889_v29  ;;  %v1579_v3 = vpop.xlane.xlu1 %1578  ;;  %v1758_v25 = vmul.f32 %v2693_v16, %v3950_v46  ;;  %v2774_v29 = vmov 0   ;;  %v1677_v12 = vadd.f32 1e-05, %v1639_v5  ;;  %v1847_v5 = vadd.f32 %v4162_v63, %v1803_v13 }
 0x4c7   :  { %2704 = vrsqrt.f32 %v1695_v34  ;;  %v1656_v52 = vmul.f32 0.03125, %v1588_v35  ;;  %2366 = vmatprep.subr.msk.mxu0 %vm122_vm1, %v1904_v59  ;;  %v1819_v31 = vmul.f32 %v4151_v36, %v1775_v37  ;;  %2589 = vset.pattern.permute.xlu0 %v2774_v29  ;;  %v1653_v46 = vmul.f32 0.03125, %v1579_v3 }
 0x4c8   :  { %v2695_v50 = vpop.eup %2694  ;;  %2706 = vrsqrt.f32 %v1679_v9  ;;  %v1848_v9 = vadd.f32 %v4162_v63, %v1804_v27  ;;  %v1902_v45 = vmax.f32 %v1864_v30, 0.0  ;;  %2174 = vperm.xlu0 %2589, %v2171_v39   ;;  %v1676_v35 = vadd.f32 1e-05, %v1638_v33 }
 0x4c9   :  { %v1694_v21 = vadd.f32 1e-05, %v1656_v52  ;;  %v1774_v32 = vmul.f32 %v2695_v50, %v4001_v55  ;;  %v2697_v15 = vpop.eup %2696  ;;  %v1863_v59 = vadd.f32 %v4162_v63, %v1819_v31  ;;  %v1802_v58 = vmul.f32 %v4151_v36, %v1758_v25 }
 0x4ca   :  { %v1585_v62 = vpop.xlane.xlu0 %1584  ;;  %2367 = vmatpush3.xpose.msk.msra.mxu0 %vm122_vm1, %v1888_v61  ;;  %v1757_v44 = vmul.f32 %v2697_v15, %v3961_v49  ;;  %v1886_v27 = vmax.f32 %v1848_v9, 0.0  ;;  %v1528_v30 = vpop.xlane.xlu1 %1527  ;;  %v1885_v15 = vmax.f32 %v1847_v5, 0.0 }
 0x4cb   :  { %2708 = vrsqrt.f32 %v1694_v21  ;;  %v1655_v19 = vmul.f32 0.03125, %v1585_v62  ;;  %2368 = vmatprep.subr.msk.mxu0 %vm122_vm1, %v1903_v17  ;;  %v1818_v28 = vmul.f32 %v4151_v36, %v1774_v32  ;;  %v1901_v3 = vmax.f32 %v1863_v59, 0.0 }
 0x4cc   :  { %v2699_v55 = vpop.eup %2698  ;;  %2710 = vrsqrt.f32 %v1678_v38  ;;  %v1691_v38 = vadd.f32 1e-05, %v1653_v46  ;;  %v1846_v32 = vadd.f32 %v4162_v63, %v1802_v58  ;;  %v1801_v33 = vmul.f32 %v4151_v36, %v1757_v44 }
 0x4cd   :  { %v1693_v34 = vadd.f32 1e-05, %v1655_v19  ;;  %v1773_v37 = vmul.f32 %v2699_v55, %v4012_v24  ;;  %v2701_v16 = vpop.eup %2700  ;;  %v1862_v17 = vadd.f32 %v4162_v63, %v1818_v28 }
 0x4ce   :  { %v1582_v61 = vpop.xlane.xlu0 %1581  ;;  %2369 = vmatpush3.xpose.msk.msra.mxu0 %vm122_vm1, %v1887_v48  ;;  %v1756_v39 = vmul.f32 %v2701_v16, %v3973_v57  ;;  %v1636_v48 = vmul.f32 0.03125, %v1528_v30  ;;  %v1884_v46 = vmax.f32 %v1846_v32, 0.0 }
 0x4cf   :  { %2712 = vrsqrt.f32 %v1693_v34  ;;  %v1654_v52 = vmul.f32 0.03125, %v1582_v61  ;;  %2370 = vmatprep.subr.msk.mxu0 %vm122_vm1, %v1902_v45  ;;  %v1817_v24 = vmul.f32 %v4151_v36, %v1773_v37  ;;  %v1900_v13 = vmax.f32 %v1862_v17, 0.0 }
 0x4d0   :  { %v2703_v50 = vpop.eup %2702  ;;  %2714 = vrsqrt.f32 %v1677_v12  ;;  %v1845_v45 = vadd.f32 %v4162_v63, %v1801_v33  ;;  %v1800_v34 = vmul.f32 %v4151_v36, %v1756_v39  ;;  %v1674_v37 = vadd.f32 1e-05, %v1636_v48 }
 0x4d1   :  { %v1692_v21 = vadd.f32 1e-05, %v1654_v52  ;;  %v1772_v31 = vmul.f32 %v2703_v50, %v4026_v41  ;;  %2716 = vrsqrt.f32 %v1676_v35  ;;  %v1861_v41 = vadd.f32 %v4162_v63, %v1817_v24 }
 0x4d2   :  { %v1531_v49 = vpop.xlane.xlu0 %1530  ;;  %2371 = vmatpush3.xpose.msk.msra.mxu0 %vm122_vm1, %v1886_v27  ;;  %v1883_v52 = vmax.f32 %v1845_v45, 0.0  ;;  %v1844_v50 = vadd.f32 %v4162_v63, %v1800_v34 }
 0x4d3   :  { %2718 = vrsqrt.f32 %v1692_v21  ;;  %v1637_v25 = vmul.f32 0.03125, %v1531_v49  ;;  %2372 = vmatprep.subr.msk.mxu0 %vm122_vm1, %v1901_v3  ;;  %v1816_v29 = vmul.f32 %v4151_v36, %v1772_v31  ;;  %v1899_v35 = vmax.f32 %v1861_v41, 0.0 }
 0x4d4   :  { %v2705_v62 = vpop.eup %2704  ;;  %2720 = vrsqrt.f32 %v1691_v38  ;;  %v1882_v31 = vmax.f32 %v1844_v50, 0.0 }
 0x4d5   :  { %v2707_v19 = vpop.eup %2706  ;;  %v1675_v9 = vadd.f32 1e-05, %v1637_v25  ;;  %v1771_v55 = vmul.f32 %v2705_v62, %v4039_v47  ;;  %v1860_v47 = vadd.f32 %v4162_v63, %v1816_v29 }
 0x4d6   :  { %v1576_v57 = vpop.xlane.xlu0 %1575  ;;  %2373 = vmatpush3.xpose.msk.msra.mxu0 %vm122_vm1, %v1885_v15  ;;  %v1755_v28 = vmul.f32 %v2707_v19, %v3988_v56 }
 0x4d7   :  { %v1652_v12 = vmul.f32 0.03125, %v1576_v57  ;;  %2374 = vmatprep.subr.msk.mxu0 %vm122_vm1, %v1900_v13  ;;  %2722 = vrsqrt.f32 %v1675_v9  ;;  %v1815_v16 = vmul.f32 %v4151_v36, %v1771_v55  ;;  %v1898_v24 = vmax.f32 %v1860_v47, 0.0 }
 0x4d8   :  { %v2709_v59 = vpop.eup %2708  ;;  %v1799_v38 = vmul.f32 %v4151_v36, %v1755_v28 }
 0x4d9   :  { %v2711_v61 = vpop.eup %2710  ;;  %v1690_v58 = vadd.f32 1e-05, %v1652_v12  ;;  %v1770_v44 = vmul.f32 %v2709_v59, %v4049_v10  ;;  %v1859_v30 = vadd.f32 %v4162_v63, %v1815_v16 }
 0x4da   :  { %2375 = vmatpush3.xpose.msk.msra.mxu0 %vm122_vm1, %v1884_v46  ;;  %v1754_v56 = vmul.f32 %v2711_v61, %v3998_v4  ;;  %v1843_v49 = vadd.f32 %v4162_v63, %v1799_v38 }
 0x4db   :  { %2724 = vrsqrt.f32 %v1690_v58  ;;  %2376 = vmatprep.subr.msk.mxu0 %vm122_vm1, %v1899_v35  ;;  %v1814_v10 = vmul.f32 %v4151_v36, %v1770_v44  ;;  %v1897_v25 = vmax.f32 %v1859_v30, 0.0 }
 0x4dc   :  { %v2713_v27 = vpop.eup %2712  ;;  %2726 = vrsqrt.f32 %v1674_v37  ;;  %v1798_v32 = vmul.f32 %v4151_v36, %v1754_v56 }
 0x4dd   :  { %v2715_v5 = vpop.eup %2714  ;;  %v1769_v21 = vmul.f32 %v2713_v27, %v4057_v18  ;;  %v1858_v33 = vadd.f32 %v4162_v63, %v1814_v10 }
 0x4de   :  { %2377 = vmatpush3.xpose.msk.msra.mxu0 %vm122_vm1, %v1883_v52  ;;  %v2717_v3 = vpop.eup %2716  ;;  %v1753_v4 = vmul.f32 %v2715_v5, %v4009_v23  ;;  %v1881_v23 = vmax.f32 %v1843_v49, 0.0  ;;  %v1842_v15 = vadd.f32 %v4162_v63, %v1798_v32 }
 0x4df   :  { %2378 = vmatprep.subr.msk.mxu0 %vm122_vm1, %v1898_v24  ;;  %v1813_v62 = vmul.f32 %v4151_v36, %v1769_v21  ;;  %v1752_v48 = vmul.f32 %v2717_v3, %v4021_v43  ;;  %v1896_v9 = vmax.f32 %v1858_v33, 0.0 }
 0x4e0   :  { %v2719_v17 = vpop.eup %2718  ;;  %v1797_v41 = vmul.f32 %v4151_v36, %v1753_v4  ;;  %v1880_v57 = vmax.f32 %v1842_v15, 0.0 }
 0x4e1   :  { %v2721_v39 = vpop.eup %2720  ;;  %v1768_v18 = vmul.f32 %v2719_v17, %v4066_v11  ;;  %v1857_v13 = vadd.f32 %v4162_v63, %v1813_v62  ;;  %v1796_v46 = vmul.f32 %v4151_v36, %v1752_v48 }
 0x4e2   :  { %2379 = vmatpush3.xpose.msk.msra.mxu0 %vm122_vm1, %v1882_v31  ;;  %v1767_v55 = vmul.f32 %v2721_v39, %v4036_v7  ;;  %v1841_v12 = vadd.f32 %v4162_v63, %v1797_v41 }
 0x4e3   :  { %2380 = vmatprep.subr.msk.mxu0 %vm122_vm1, %v1897_v25  ;;  %v1812_v29 = vmul.f32 %v4151_v36, %v1768_v18  ;;  %v1895_v34 = vmax.f32 %v1857_v13, 0.0  ;;  %v1840_v35 = vadd.f32 %v4162_v63, %v1796_v46 }
 0x4e4   :  { %v2723_v19 = vpop.eup %2722  ;;  %v1811_v28 = vmul.f32 %v4151_v36, %v1767_v55 }
 0x4e5   :  { %v1751_v43 = vmul.f32 %v2723_v19, %v4073_v40  ;;  %v1856_v59 = vadd.f32 %v4162_v63, %v1812_v29  ;;  %v1879_v40 = vmax.f32 %v1841_v12, 0.0 }
 0x4e6   :  { %2381 = vmatpush3.xpose.msk.msra.mxu0 %vm122_vm1, %v1881_v23  ;;  %v1855_v47 = vadd.f32 %v4162_v63, %v1811_v28 }
 0x4e7   :  { %2382 = vmatprep.subr.msk.mxu0 %vm122_vm1, %v1896_v9  ;;  %v1795_v61 = vmul.f32 %v4151_v36, %v1751_v43  ;;  %v1894_v58 = vmax.f32 %v1856_v59, 0.0 }
 0x4e8   :  { %v2725_v11 = vpop.eup %2724 }
 0x4e9   :  { %v2727_v45 = vpop.eup %2726  ;;  %v1766_v7 = vmul.f32 %v2725_v11, %v4079_v0  ;;  %v1878_v0 = vmax.f32 %v1840_v35, 0.0  ;;  %v1839_v44 = vadd.f32 %v4162_v63, %v1795_v61 }
 0x4ea   :  { %2383 = vmatpush3.xpose.msk.msra.mxu0 %vm122_vm1, %v1880_v57  ;;  %v1750_v37 = vmul.f32 %v2727_v45, %v4046_v8  ;;  %v1893_v8 = vmax.f32 %v1855_v47, 0.0 }
 0x4eb   :  { %2384 = vmatprep.subr.msk.mxu0 %vm122_vm1, %v1895_v34  ;;  %v1810_v16 = vmul.f32 %v4151_v36, %v1766_v7  ;;  %v1877_v56 = vmax.f32 %v1839_v44, 0.0 }
 0x4ec   :  { %v1794_v52 = vmul.f32 %v4151_v36, %v1750_v37 }
 0x4ed   :  { %v1854_v27 = vadd.f32 %v4162_v63, %v1810_v16 }
 0x4ee   :  { %2385 = vmatpush3.xpose.msk.msra.mxu0 %vm122_vm1, %v1879_v40  ;;  %v1838_v50 = vadd.f32 %v4162_v63, %v1794_v52 }
 0x4ef   :  { %2386 = vmatprep.subr.msk.mxu0 %vm122_vm1, %v1894_v58  ;;  %v1892_v38 = vmax.f32 %v1854_v27, 0.0 }
 0x4f0   :  { %v1876_v5 = vmax.f32 %v1838_v50, 0.0 }
 0x4f2   :  { %2387 = vmatpush3.xpose.msk.msra.mxu0 %vm122_vm1, %v1878_v0 }
 0x4f3   :  { %2388 = vmatprep.subr.msk.mxu0 %vm122_vm1, %v1893_v8 }
 0x4f6   :  { %2389 = vmatpush3.xpose.msk.msra.mxu0 %vm122_vm1, %v1877_v56 }
 0x4f7   :  { %2390 = vmatprep.subr.msk.mxu0 %vm122_vm1, %v1892_v38 }
 0x4fa   :  { %2391 = vmatpush3.xpose.msk.msra.mxu0 %vm122_vm1, %v1876_v5 }
 0x513   :  { %v1630_v24 = vpop.xlane.xlu1 %1629 }
 0x514   :  { %v1670_v30 = vmul.f32 0.03125, %v1630_v24 }
 0x516   :  { %v1708_v10 = vadd.f32 1e-05, %v1670_v30 }
 0x517   :  { %v1633_v21 = vpop.xlane.xlu0 %1632  ;;  %v1573_v3 = vpop.xlane.xlu1 %1572 }
 0x518   :  { %2728 = vrsqrt.f32 %v1708_v10  ;;  %v1671_v17 = vmul.f32 0.03125, %v1633_v21  ;;  %v1651_v4 = vmul.f32 0.03125, %v1573_v3 }
 0x51a   :  { %v1709_v31 = vadd.f32 1e-05, %v1671_v17  ;;  %v1689_v49 = vadd.f32 1e-05, %v1651_v4 }
 0x51b   :  { %v1627_v32 = vpop.xlane.xlu0 %1626  ;;  %v1624_v39 = vpop.xlane.xlu1 %1623 }
 0x51c   :  { %2730 = vrsqrt.f32 %v1709_v31  ;;  %v1669_v25 = vmul.f32 0.03125, %v1627_v32  ;;  %v1668_v33 = vmul.f32 0.03125, %v1624_v39 }
 0x51d   :  { %2732 = vrsqrt.f32 %v1689_v49 }
 0x51e   :  { %v1707_v62 = vadd.f32 1e-05, %v1669_v25  ;;  %v1706_v18 = vadd.f32 1e-05, %v1668_v33 }
 0x51f   :  { %v1525_v48 = vpop.xlane.xlu0 %1524  ;;  %v1522_v23 = vpop.xlane.xlu1 %1521 }
 0x520   :  { %2734 = vrsqrt.f32 %v1707_v62  ;;  %v1635_v15 = vmul.f32 0.03125, %v1525_v48  ;;  %v1634_v41 = vmul.f32 0.03125, %v1522_v23 }
 0x521   :  { %2736 = vrsqrt.f32 %v1706_v18 }
 0x522   :  { %v1673_v19 = vadd.f32 1e-05, %v1635_v15  ;;  %v1672_v9 = vadd.f32 1e-05, %v1634_v41 }
 0x523   :  { %v1570_v13 = vpop.xlane.xlu0 %1569  ;;  %v1618_v29 = vpop.xlane.xlu1 %1617 }
 0x524   :  { %2738 = vrsqrt.f32 %v1673_v19  ;;  %v1650_v55 = vmul.f32 0.03125, %v1570_v13  ;;  %v1666_v11 = vmul.f32 0.03125, %v1618_v29  ;;  %v2177_v19 = vlaneseq }
 0x525   :  { %v2729_v43 = vpop.eup %2728  ;;  %2740 = vrsqrt.f32 %v1672_v9 }
 0x526   :  { %v1688_v57 = vadd.f32 1e-05, %v1650_v55  ;;  %v1704_v12 = vadd.f32 1e-05, %v1666_v11  ;;  %v1784_v45 = vmul.f32 %v2729_v43, %v4086_v51  ;;  %v2178_v9 = vshrl.u32 %v2177_v19, 7 }
 0x527   :  { %v1621_v46 = vpop.xlane.xlu0 %1620  ;;  %v2775_v55 = vmov 1966171168   ;;  %vm2213_vm3 = vcmp.lt.s32.totalorder %v2177_v19, 304 }
 0x528   :  { %2742 = vrsqrt.f32 %v1688_v57  ;;  %v1667_v34 = vmul.f32 0.03125, %v1621_v46  ;;  %v1828_v61 = vmul.f32 %v4151_v36, %v1784_v45  ;;  %v2179_v13 = vsub.s32 0, %v2178_v9 }
 0x529   :  { %v2731_v59 = vpop.eup %2730  ;;  %2744 = vrsqrt.f32 %v1704_v12  ;;  %v2189_v11 = vunpack.c.l.s4 %v2775_v55 }
 0x52a   :  { %v2733_v28 = vpop.eup %2732  ;;  %v1785_v7 = vmul.f32 %v2731_v59, %v4091_v6  ;;  %v1705_v37 = vadd.f32 1e-05, %v1667_v34 }
 0x52b   :  { %v1765_v40 = vmul.f32 %v2733_v28, %v4094_v20  ;;  %v1872_v20 = vadd.f32 %v4162_v63, %v1828_v61  ;;  %v2190_v57 = vunpack.c.0.s8 %v2189_v11 }
 0x52c   :  { %2746 = vrsqrt.f32 %v1705_v37  ;;  %v1829_v35 = vmul.f32 %v4151_v36, %v1785_v7 }
 0x52d   :  { %v2735_v58 = vpop.eup %2734  ;;  %v1809_v47 = vmul.f32 %v4151_v36, %v1765_v40  ;;  %v1910_v5 = vmax.f32 %v1872_v20, 0.0  ;;  %v2193_v34 = vsub.s32 %v2190_v57, %v2178_v9 }
 0x52e   :  { %v2737_v16 = vpop.eup %2736  ;;  %v1783_v51 = vmul.f32 %v2735_v58, %v4102_v26  ;;  %v1873_v0 = vadd.f32 %v4162_v63, %v1829_v35 }
 0x52f   :  { %v1782_v44 = vmul.f32 %v2737_v16, %v4105_v14  ;;  %v1853_v6 = vadd.f32 %v4162_v63, %v1809_v47 }
 0x530   :  { %v1911_v52 = vmax.f32 %v1873_v0, 0.0  ;;  %v1827_v8 = vmul.f32 %v4151_v36, %v1783_v51 }
 0x531   :  { %v2739_v27 = vpop.eup %2738  ;;  %v1891_v56 = vmax.f32 %v1853_v6, 0.0  ;;  %v1826_v14 = vmul.f32 %v4151_v36, %v1782_v44 }
 0x532   :  { %v2741_v50 = vpop.eup %2740  ;;  %v1749_v38 = vmul.f32 %v2739_v27, %v4114_v42  ;;  %2570 = vmatpush3.xpose.msk.msra.mxu1 %vm122_vm1, %v1911_v52  ;;  %v1871_v30 = vadd.f32 %v4162_v63, %v1827_v8 }
 0x533   :  { %v1748_v26 = vmul.f32 %v2741_v50, %v4117_v22  ;;  %2392 = vmatprep.subr.msk.mxu0 %vm122_vm1, %v1891_v56  ;;  %2571 = vmatprep.subr.mxu1 %v2772_v2  ;;  %v1870_v17 = vadd.f32 %v4162_v63, %v1826_v14 }
 0x534   :  { %v1793_v24 = vmul.f32 %v4151_v36, %v1749_v38  ;;  %v1909_v49 = vmax.f32 %v1871_v30, 0.0 }
 0x535   :  { %v2743_v10 = vpop.eup %2742  ;;  %v1792_v21 = vmul.f32 %v4151_v36, %v1748_v26  ;;  %v1908_v18 = vmax.f32 %v1870_v17, 0.0 }
 0x536   :  { %v2745_v3 = vpop.eup %2744  ;;  %2572 = vmatpush3.xpose.msk.msra.mxu1 %vm122_vm1, %v1910_v5  ;;  %v1837_v42 = vadd.f32 %v4162_v63, %v1793_v24  ;;  %v1764_v22 = vmul.f32 %v2743_v10, %v4126_v1 }
 0x537   :  { %2573 = vmatprep.subr.mxu1 %v2772_v2  ;;  %v1780_v4 = vmul.f32 %v2745_v3, %v4129_v60  ;;  %v1836_v25 = vadd.f32 %v4162_v63, %v1792_v21 }
 0x538   :  { %v1875_v31 = vmax.f32 %v1837_v42, 0.0  ;;  %v1808_v32 = vmul.f32 %v4151_v36, %v1764_v22 }
 0x539   :  { %v2747_v39 = vpop.eup %2746  ;;  %v1824_v48 = vmul.f32 %v4151_v36, %v1780_v4  ;;  %v1874_v23 = vmax.f32 %v1836_v25, 0.0 }
 0x53a   :  { %v1781_v33 = vmul.f32 %v2747_v39, %v4138_v53  ;;  %2393 = vmatpush3.xpose.msk.msra.mxu0 %vm122_vm1, %v1875_v31  ;;  %2574 = vmatpush3.xpose.msk.msra.mxu1 %vm122_vm1, %v1909_v49  ;;  %v1852_v1 = vadd.f32 %v4162_v63, %v1808_v32 }
 0x53b   :  { %2575 = vmatprep.subr.mxu1 %v2772_v2  ;;  %v1868_v41 = vadd.f32 %v4162_v63, %v1824_v48 }
 0x53c   :  { %v1890_v62 = vmax.f32 %v1852_v1, 0.0  ;;  %v1825_v60 = vmul.f32 %v4151_v36, %v1781_v33 }
 0x53d   :  { %v1906_v36 = vmax.f32 %v1868_v41, 0.0 }
 0x53e   :  { %2394 = vmatprep.subr.msk.mxu0 %vm122_vm1, %v1890_v62  ;;  %2576 = vmatpush3.xpose.msk.msra.mxu1 %vm122_vm1, %v1908_v18  ;;  %v1869_v53 = vadd.f32 %v4162_v63, %v1825_v60 }
 0x53f   :  { %2395 = vmatpush3.xpose.msk.msra.mxu0 %vm122_vm1, %v1874_v23  ;;  %2577 = vmatprep.subr.mxu1 %v2772_v2 }
 0x540   :  { %v1907_v15 = vmax.f32 %v1869_v53, 0.0 }
 0x542   :  { %2578 = vmatpush3.xpose.msk.msra.mxu1 %vm122_vm1, %v1907_v15  ;;  %2397 = vmatmul.mubr.msk.f32.vlgmr.msra.gmra.mxu0 %vm122_vm1, %v4175_v54 }
 0x543   :  { %2579 = vmatprep.subr.mxu1 %v2772_v2  ;;  %v2175_v29 = vpop.permute.xlu0 %2174 }
 0x544   :  { %v2180_v63 = vrot.slane %v2175_v29, %v2179_v13 }
 0x546   :  { %2580 = vmatpush3.xpose.msk.msra.mxu1 %vm122_vm1, %v1906_v36 }
 0x549   :  { %2582 = vmatmul.mubr.msk.f32.vlgmr.msra.gmra.mxu1 %vm122_vm1, %v4175_v54 }
 0x602   :  { %v2096_v43 = vpop.f32.mrf.mxu0 }
 0x603   :  { %v2181_v12 = vadd.f32 %v2180_v63, %v2096_v43 }
 0x604   :  { %v2098_v46 = vpop.f32.mrf.mxu0 }
 0x605   :  { %v2182_v45 = vadd.f32 %v2180_v63, %v2098_v46 }
 0x607   :  { %v2187_v2 = vcombine.low %v2181_v12, %v2182_v45 }
 0x609   :  { %v2167_v59 = vpop.f32.mrf.mxu1  ;;  %v2194_v37 = vrot.slane %v2187_v2, %v2193_v34 }
 0x60a   :  { %v2183_v28 = vadd.f32 %v2180_v63, %v2167_v59 }
 0x60b   :  { %v2583_v7 = vpop.f32.mrf.mxu1 }
 0x60c   :  { %v2201_v40 = vrot.slane %v2183_v28, %v2193_v34 }
 0x60e   :  { %v2202_v54 = vcombine.low %v2194_v37, %v2201_v40 }
 0x610   :  { %v2209_v35 = vrot.slane %v2202_v54, %v2193_v34 }
 0x612   :  { %2215 = vst.msk [vmem:[#allocation3] sm:$0x7] %vm2213_vm3, %v2209_v35 }
 0x613   :  { %2761 = shalt.err (!%p2758_p4)
}
 0x614   :  { %2225 = dma.vmem_to_hbm [thread:$0]  %s2223_s12, 48, %s4337_s11, [#allocation4]  }
 0x615   :  { %2770 = dma.done.wait [#allocation4], 48  }
 0x616   :  { %2771 = vsyncadd [#allocation4], 4294967248 }
 0x617   :  { %2229 = vsyncpa [#allocation4], 1 }

</bundles_post_ra>
